<compile_context>
chip_gen: v5e
topology: v5e:2x2
jax: 0.10.0
libtpu: 0.0.40
codegen_flags: <defaults>
</compile_context>

<pallas_src>
import jax
import jax.numpy as jnp
from jax.experimental import pallas as pl
from jax.experimental.pallas import tpu as pltpu

B = 32              # molecules in the batch
N = 16              # padded atoms per molecule
D = 32              # embedding dim (gin_gnn.x_embedding2.embedding_dim)
H = 2 * D           # GIN MLP hidden dim (Linear(D, 2D) -> ReLU -> Linear(2D, D))
NUM_LAYERS = 2      # message-passing layers
BT = 16             # graphs per grid step
R = BT * N          # node rows per grid step              : 256
NP = 2              # independent panels per grid step
P = R // NP         # panel width/height (>= 128, lane-dense): 128
GP = P // N         # graphs per panel                      : 8
NT = B // BT        # grid size                             : 2

assert P == 128 and B % BT == 0 and BT % GP == 0


# ---------------------------------------------------------------------------
# Fused kernel: both GIN layers + folded BatchNorm + ReLU + mean pool,
# processed as NP independent block-diagonal 128-wide panels.
# ---------------------------------------------------------------------------
def fused_gin_kernel(h_ref, adj_ref, esum_ref, w1_ref, b1_ref, w2_ref, b2_ref,
                     pool_ref, o_ref):
    # Hoist per-layer weight loads out of the panel loop (broadcasts are not CSE'd).
    w1 = [w1_ref[l] for l in range(NUM_LAYERS)]      # (D, H)  f32
    b1 = [b1_ref[l] for l in range(NUM_LAYERS)]      # (1, H)
    w2 = [w2_ref[l] for l in range(NUM_LAYERS)]      # (H, D)  BatchNorm folded in
    b2 = [b2_ref[l] for l in range(NUM_LAYERS)]      # (1, D)

    pooled = []
    for p in range(NP):                              # 2 independent 128-row panels (8 graphs)
        h = h_ref[p * P:(p + 1) * P, :]              # (P, D) node embeddings, f32
        a = adj_ref[p].astype(jnp.float32)           # (P, P) block-diag adjacency (+self loops)
        for l in range(NUM_LAYERS):
            # GINConv aggregation: sum_{j in N(i) U {i}} h_j  (+ per-node edge-embedding sums,
            # precomputed on host since they are independent of h).
            agg = jnp.dot(a, h, preferred_element_type=jnp.float32)
            agg = agg + esum_ref[l, p * P:(p + 1) * P, :]
            # MLP: Linear(D, 2D) -> ReLU -> Linear(2D, D); BatchNorm (eval) folded into W2/b2.
            hid = jnp.dot(agg, w1[l], preferred_element_type=jnp.float32) + b1[l]
            hid = jnp.maximum(hid, 0.0)
            out = jnp.dot(hid, w2[l], preferred_element_type=jnp.float32) + b2[l]
            if l < NUM_LAYERS - 1:
                out = jnp.maximum(out, 0.0)          # inter-layer ReLU (drop_ratio = 0)
            h = out
        # global mean pool: validity mask and 1/n_atoms are folded into pool_ref on the host,
        # so this is a single (GP, P) @ (P, D) matmul per panel -- no iota/mask/divide.
        pooled.append(jnp.dot(pool_ref[p], h, preferred_element_type=jnp.float32))

    o_ref[...] = jnp.concatenate(pooled, axis=0).astype(o_ref.dtype)   # (BT, D)


# ---------------------------------------------------------------------------
# Wrapper
# ---------------------------------------------------------------------------
def gin_forward(h0_flat, adj_panels, esum_all, w1_all, b1_all, w2_all, b2_all, pool_mat):
    inputs = (h0_flat, adj_panels, esum_all, w1_all, b1_all, w2_all, b2_all, pool_mat)

    flops = NT * NP * (NUM_LAYERS * (2 * P * P * D + 4 * P * D * H) + 2 * GP * P * D)
    bytes_accessed = sum(int(a.size) * a.dtype.itemsize for a in inputs) + B * D * 4
    cost = pl.CostEstimate(flops=flops, transcendentals=0, bytes_accessed=bytes_accessed)

    grid_spec = pltpu.PrefetchScalarGridSpec(
        num_scalar_prefetch=0,
        grid=(NT,),
        in_specs=[
            pl.BlockSpec((R, D), lambda i: (i, 0)),                       # node embeddings
            pl.BlockSpec((NP, P, P), lambda i: (i, 0, 0)),                # bf16 adjacency panels
            pl.BlockSpec((NUM_LAYERS, R, D), lambda i: (0, i, 0)),        # edge-embedding sums
            pl.BlockSpec((NUM_LAYERS, D, H), lambda i: (0, 0, 0)),        # MLP linear 1
            pl.BlockSpec((NUM_LAYERS, 1, H), lambda i: (0, 0, 0)),
            pl.BlockSpec((NUM_LAYERS, H, D), lambda i: (0, 0, 0)),        # MLP linear 2 (+BN)
            pl.BlockSpec((NUM_LAYERS, 1, D), lambda i: (0, 0, 0)),
            pl.BlockSpec((NP, GP, P), lambda i: (i, 0, 0)),               # mean-pool matrix
        ],
        out_specs=pl.BlockSpec((BT, D), lambda i: (i, 0)),
    )
    return pl.pallas_call(
        fused_gin_kernel,
        out_shape=jax.ShapeDtypeStruct((B, D), jnp.float32),
        grid_spec=grid_spec,
        compiler_params=pltpu.CompilerParams(dimension_semantics=("parallel",)),
        cost_estimate=cost,
    )(*inputs)


# ---------------------------------------------------------------------------
# Main: deterministic parameters + synthetic molecular graphs
# ---------------------------------------------------------------------------
if __name__ == "__main__":
    key = jax.random.PRNGKey(0)
    ks = jax.random.split(key, 11)

    # --- parameters implied by the module (atom / chirality / per-layer bond+dir tables,
    #     per-layer GIN MLP, per-layer BatchNorm) -------------------------------------
    x_emb1 = 0.1 * jax.random.normal(ks[0], (119, D), jnp.float32)   # possible_atomic_num_list
    x_emb2 = 0.1 * jax.random.normal(ks[1], (4, D), jnp.float32)     # possible_chirality_list

    edge_emb1 = [0.1 * jax.random.normal(jax.random.fold_in(ks[2], l), (5, D), jnp.float32)
                 for l in range(NUM_LAYERS)]     # possible_bonds (+ index 4 = self-loop type)
    edge_emb2 = [0.1 * jax.random.normal(jax.random.fold_in(ks[3], l), (3, D), jnp.float32)
                 for l in range(NUM_LAYERS)]     # possible_bond_dirs

    W1 = [jax.random.normal(jax.random.fold_in(ks[4], l), (D, H), jnp.float32) / jnp.sqrt(D)
          for l in range(NUM_LAYERS)]
    B1 = [jnp.zeros((H,), jnp.float32) for _ in range(NUM_LAYERS)]
    W2 = [jax.random.normal(jax.random.fold_in(ks[5], l), (H, D), jnp.float32) / jnp.sqrt(H)
          for l in range(NUM_LAYERS)]
    B2 = [jnp.zeros((D,), jnp.float32) for _ in range(NUM_LAYERS)]

    # BatchNorm (eval mode) folded into the second linear of each MLP.
    bn_eps = 1e-5
    w2f, b2f = [], []
    for l in range(NUM_LAYERS):
        gamma = 1.0 + 0.05 * jax.random.normal(jax.random.fold_in(ks[6], l), (D,), jnp.float32)
        beta = 0.05 * jax.random.normal(jax.random.fold_in(ks[7], l), (D,), jnp.float32)
        mean = 0.05 * jax.random.normal(jax.random.fold_in(ks[8], l), (D,), jnp.float32)
        var = 1.0 + 0.1 * jax.random.uniform(jax.random.fold_in(ks[9], l), (D,), jnp.float32)
        scale = gamma / jnp.sqrt(var + bn_eps)
        w2f.append(W2[l] * scale[None, :])
        b2f.append((B2[l] - mean) * scale + beta)

    w1_all = jnp.stack(W1)                                     # (L, D, H)
    b1_all = jnp.stack([b.reshape(1, H) for b in B1])          # (L, 1, H)
    w2_all = jnp.stack(w2f)                                    # (L, H, D)
    b2_all = jnp.stack([b.reshape(1, D) for b in b2f])         # (L, 1, D)

    # TODO(synk): SMILES -> RDKit mol -> graph (Gin.transform / mol_to_graph_data_obj_simple)
    # is host-side RDKit preprocessing with no Pallas equivalent; synthetic chain molecules
    # (bond between consecutive atoms) stand in for it.
    kg = jax.random.split(ks[10], 5)
    n_atoms = jax.random.randint(kg[0], (B,), 4, N + 1).astype(jnp.int32)   # atoms / molecule
    atom_idx = jax.random.randint(kg[1], (B, N), 0, 119)                    # atom feature 0
    chir_idx = jax.random.randint(kg[2], (B, N), 0, 4)                      # atom feature 1
    bond_type = jax.random.randint(kg[3], (B, N), 0, 4)                     # bond k: atoms k,k+1
    bond_dir = jax.random.randint(kg[4], (B, N), 0, 3)

    idx = jnp.arange(N)
    node_valid = idx[None, :] < n_atoms[:, None]                            # (B, N)
    bond_valid = idx[None, :] < (n_atoms[:, None] - 1)                      # bond k exists

    # initial node embeddings (embedding-table gather = glue JAX), flattened to (B*N, D)
    h0 = (x_emb1[atom_idx] + x_emb2[chir_idx]) * node_valid[..., None].astype(jnp.float32)
    h0_flat = h0.reshape(B * N, D).astype(jnp.float32)

    # dense chain adjacency with self-loops, validity-masked, assembled VECTORIZED into
    # block-diagonal 128x128 panels of GP=8 graphs, stored bf16 (0/1 exact in bf16).
    ii, jj = idx[:, None], idx[None, :]
    chain = (jnp.abs(ii - jj) == 1) | (ii == jj)
    valid_pair = node_valid[:, :, None] & node_valid[:, None, :]
    adj = (chain[None] & valid_pair).astype(jnp.float32)                    # (B, N, N)
    adj5 = adj.reshape(NT * NP, GP, N, N)
    eye_g = jnp.eye(GP, dtype=jnp.float32)
    adj_panels = (adj5[:, :, :, None, :] * eye_g[None, :, None, :, None]
                  ).reshape(NT * NP, P, P).astype(jnp.bfloat16)             # (NT*NP, 128, 128)

    # per-layer, per-node sums of incident edge embeddings (incl. the self-loop edge:
    # bond type 4 / direction 0) -- independent of h, so precomputed on host.
    esum_layers = []
    for l in range(NUM_LAYERS):
        e_bond = edge_emb1[l][bond_type] + edge_emb2[l][bond_dir]           # (B, N, D)
        right = jnp.where(bond_valid[..., None], e_bond, 0.0)               # bond k at node k
        left = jnp.concatenate([jnp.zeros_like(right[:, :1]), right[:, :-1]], axis=1)
        self_e = edge_emb1[l][4] + edge_emb2[l][0]                          # (D,)
        es = jnp.where(node_valid[..., None], self_e[None, None] + right + left, 0.0)
        esum_layers.append(es.reshape(B * N, D))
    esum_all = jnp.stack(esum_layers).astype(jnp.float32)                   # (L, B*N, D)

    # mean-pool matrix: node validity AND 1/n_atoms folded in (review item 4).
    col = jnp.arange(P)
    graph_of_col = col // N
    atom_of_col = col % N
    n_flat = n_atoms.reshape(NT * NP, GP)                                   # (NT*NP, GP)
    sel = graph_of_col[None, None, :] == jnp.arange(GP)[None, :, None]      # (1, GP, P)
    valid_col = atom_of_col[None, None, :] < n_flat[:, :, None]             # (NT*NP, GP, P)
    inv_n = (1.0 / n_flat.astype(jnp.float32))[:, :, None]                  # n_atoms >= 4
    pool_mat = jnp.where(sel & valid_col, inv_n, 0.0).astype(jnp.float32)   # (NT*NP, GP, P)

    # --- run the fused kernel ---------------------------------------------------------
    graph_repr = gin_forward(h0_flat, adj_panels, esum_all,
                             w1_all, b1_all, w2_all, b2_all, pool_mat)
    graph_repr = jax.block_until_ready(graph_repr)

    # --- pure-JAX reference (dense, f32) ------------------------------------------------
    h_nodes = h0
    for l in range(NUM_LAYERS):
        agg = jnp.einsum('bij,bjd->bid', adj, h_nodes) + esum_layers[l].reshape(B, N, D)
        hid = jnp.maximum(jnp.einsum('bnd,dh->bnh', agg, W1[l]) + B1[l], 0.0)
        out = jnp.einsum('bnh,hd->bnd', hid, w2f[l]) + b2f[l]
        if l < NUM_LAYERS - 1:
            out = jnp.maximum(out, 0.0)
        h_nodes = out
    ref = (h_nodes * node_valid[..., None].astype(jnp.float32)).sum(axis=1) \
        / n_atoms[:, None].astype(jnp.float32)

    assert graph_repr.shape == (B, D)
    assert bool(jnp.all(jnp.isfinite(graph_repr)))
    assert bool(jnp.allclose(graph_repr, ref, atol=1e-2, rtol=1e-2)), \
        float(jnp.max(jnp.abs(graph_repr - ref)))
    print("KERNEL_OK")
</pallas_src>

<mosaic_0001>
module attributes {stable_mosaic.version = 11 : i64} {
  func.func @fused_gin_kernel(%arg0: i32, %arg1: memref<256x32xf32, #tpu.memory_space<vmem>>, %arg2: memref<2x128x128xbf16, #tpu.memory_space<vmem>>, %arg3: memref<2x256x32xf32, #tpu.memory_space<vmem>>, %arg4: memref<2x32x64xf32, #tpu.memory_space<vmem>>, %arg5: memref<2x1x64xf32, #tpu.memory_space<vmem>>, %arg6: memref<2x64x32xf32, #tpu.memory_space<vmem>>, %arg7: memref<2x1x32xf32, #tpu.memory_space<vmem>>, %arg8: memref<2x8x128xf32, #tpu.memory_space<vmem>>, %arg9: memref<16x32xf32, #tpu.memory_space<vmem>>) attributes {dimension_semantics = [#tpu.dimension_semantics<parallel>], iteration_bounds = array<i64: 2>, scalar_prefetch = 0 : i64, scratch_operands = 0 : i64, tpu.core_type = #tpu.core_type<tc>, window_params = [{transform_indices = @transform_0, window_bounds = array<i64: 256, 32>}, {transform_indices = @transform_1, window_bounds = array<i64: 2, 128, 128>}, {transform_indices = @transform_2, window_bounds = array<i64: 2, 256, 32>}, {pipeline_mode = #tpu.pipeline_mode<synchronous>, transform_indices = @transform_3, window_bounds = array<i64: 2, 32, 64>}, {pipeline_mode = #tpu.pipeline_mode<synchronous>, transform_indices = @transform_4, window_bounds = array<i64: 2, 1, 64>}, {pipeline_mode = #tpu.pipeline_mode<synchronous>, transform_indices = @transform_5, window_bounds = array<i64: 2, 64, 32>}, {pipeline_mode = #tpu.pipeline_mode<synchronous>, transform_indices = @transform_6, window_bounds = array<i64: 2, 1, 32>}, {transform_indices = @transform_7, window_bounds = array<i64: 2, 8, 128>}, {transform_indices = @transform_8, window_bounds = array<i64: 16, 32>}]} {
    %c0 = arith.constant 0 : index
    %c0_0 = arith.constant 0 : index
    %c0_1 = arith.constant 0 : index
    %0 = vector.load %arg4[%c0, %c0_0, %c0_1] : memref<2x32x64xf32, #tpu.memory_space<vmem>>, vector<1x32x64xf32>
    %1 = vector.shape_cast %0 : vector<1x32x64xf32> to vector<32x64xf32>
    %c1 = arith.constant 1 : index
    %c0_2 = arith.constant 0 : index
    %c0_3 = arith.constant 0 : index
    %2 = vector.load %arg4[%c1, %c0_2, %c0_3] : memref<2x32x64xf32, #tpu.memory_space<vmem>>, vector<1x32x64xf32>
    %3 = vector.shape_cast %2 : vector<1x32x64xf32> to vector<32x64xf32>
    %c0_4 = arith.constant 0 : index
    %c0_5 = arith.constant 0 : index
    %c0_6 = arith.constant 0 : index
    %4 = vector.load %arg5[%c0_4, %c0_5, %c0_6] : memref<2x1x64xf32, #tpu.memory_space<vmem>>, vector<1x1x64xf32>
    %5 = vector.shape_cast %4 : vector<1x1x64xf32> to vector<1x64xf32>
    %c1_7 = arith.constant 1 : index
    %c0_8 = arith.constant 0 : index
    %c0_9 = arith.constant 0 : index
    %6 = vector.load %arg5[%c1_7, %c0_8, %c0_9] : memref<2x1x64xf32, #tpu.memory_space<vmem>>, vector<1x1x64xf32>
    %7 = vector.shape_cast %6 : vector<1x1x64xf32> to vector<1x64xf32>
    %c0_10 = arith.constant 0 : index
    %c0_11 = arith.constant 0 : index
    %c0_12 = arith.constant 0 : index
    %8 = vector.load %arg6[%c0_10, %c0_11, %c0_12] : memref<2x64x32xf32, #tpu.memory_space<vmem>>, vector<1x64x32xf32>
    %9 = vector.shape_cast %8 : vector<1x64x32xf32> to vector<64x32xf32>
    %c1_13 = arith.constant 1 : index
    %c0_14 = arith.constant 0 : index
    %c0_15 = arith.constant 0 : index
    %10 = vector.load %arg6[%c1_13, %c0_14, %c0_15] : memref<2x64x32xf32, #tpu.memory_space<vmem>>, vector<1x64x32xf32>
    %11 = vector.shape_cast %10 : vector<1x64x32xf32> to vector<64x32xf32>
    %c0_16 = arith.constant 0 : index
    %c0_17 = arith.constant 0 : index
    %c0_18 = arith.constant 0 : index
    %12 = vector.load %arg7[%c0_16, %c0_17, %c0_18] : memref<2x1x32xf32, #tpu.memory_space<vmem>>, vector<1x1x32xf32>
    %13 = vector.shape_cast %12 : vector<1x1x32xf32> to vector<1x32xf32>
    %c1_19 = arith.constant 1 : index
    %c0_20 = arith.constant 0 : index
    %c0_21 = arith.constant 0 : index
    %14 = vector.load %arg7[%c1_19, %c0_20, %c0_21] : memref<2x1x32xf32, #tpu.memory_space<vmem>>, vector<1x1x32xf32>
    %15 = vector.shape_cast %14 : vector<1x1x32xf32> to vector<1x32xf32>
    %c0_22 = arith.constant 0 : index
    %c0_23 = arith.constant 0 : index
    %16 = vector.load %arg1[%c0_22, %c0_23] : memref<256x32xf32, #tpu.memory_space<vmem>>, vector<128x32xf32>
    %c0_24 = arith.constant 0 : index
    %c0_25 = arith.constant 0 : index
    %c0_26 = arith.constant 0 : index
    %17 = vector.load %arg2[%c0_24, %c0_25, %c0_26] : memref<2x128x128xbf16, #tpu.memory_space<vmem>>, vector<1x128x128xbf16>
    %18 = vector.shape_cast %17 : vector<1x128x128xbf16> to vector<128x128xbf16>
    %19 = arith.extf %18 : vector<128x128xbf16> to vector<128x128xf32>
    %cst = arith.constant dense<0.000000e+00> : vector<128x32xf32>
    %20 = tpu.matmul %19, %16, %cst {dimension_numbers = #tpu.dot_dimension_numbers<[1], [0], [0], [1], [0, 0, 1, 1], [], []>} : vector<128x128xf32>, vector<128x32xf32>, vector<128x32xf32> -> vector<128x32xf32>
    %c0_27 = arith.constant 0 : index
    %c0_28 = arith.constant 0 : index
    %c0_29 = arith.constant 0 : index
    %21 = vector.load %arg3[%c0_27, %c0_28, %c0_29] : memref<2x256x32xf32, #tpu.memory_space<vmem>>, vector<1x128x32xf32>
    %22 = vector.shape_cast %21 : vector<1x128x32xf32> to vector<128x32xf32>
    %23 = arith.addf %20, %22 : vector<128x32xf32>
    %cst_30 = arith.constant dense<0.000000e+00> : vector<128x64xf32>
    %24 = tpu.matmul %23, %1, %cst_30 {dimension_numbers = #tpu.dot_dimension_numbers<[1], [0], [0], [1], [0, 0, 1, 1], [], []>} : vector<128x32xf32>, vector<32x64xf32>, vector<128x64xf32> -> vector<128x64xf32>
    %25 = vector.broadcast %5 : vector<1x64xf32> to vector<128x64xf32>
    %26 = arith.addf %24, %25 : vector<128x64xf32>
    %cst_31 = arith.constant 0.000000e+00 : f32
    %27 = vector.broadcast %cst_31 : f32 to vector<128x64xf32>
    %28 = arith.maximumf %26, %27 : vector<128x64xf32>
    %cst_32 = arith.constant dense<0.000000e+00> : vector<128x32xf32>
    %29 = tpu.matmul %28, %9, %cst_32 {dimension_numbers = #tpu.dot_dimension_numbers<[1], [0], [0], [1], [0, 0, 1, 1], [], []>} : vector<128x64xf32>, vector<64x32xf32>, vector<128x32xf32> -> vector<128x32xf32>
    %30 = vector.broadcast %13 : vector<1x32xf32> to vector<128x32xf32>
    %31 = arith.addf %29, %30 : vector<128x32xf32>
    %cst_33 = arith.constant 0.000000e+00 : f32
    %32 = vector.broadcast %cst_33 : f32 to vector<128x32xf32>
    %33 = arith.maximumf %31, %32 : vector<128x32xf32>
    %cst_34 = arith.constant dense<0.000000e+00> : vector<128x32xf32>
    %34 = tpu.matmul %19, %33, %cst_34 {dimension_numbers = #tpu.dot_dimension_numbers<[1], [0], [0], [1], [0, 0, 1, 1], [], []>} : vector<128x128xf32>, vector<128x32xf32>, vector<128x32xf32> -> vector<128x32xf32>
    %c1_35 = arith.constant 1 : index
    %c0_36 = arith.constant 0 : index
    %c0_37 = arith.constant 0 : index
    %35 = vector.load %arg3[%c1_35, %c0_36, %c0_37] : memref<2x256x32xf32, #tpu.memory_space<vmem>>, vector<1x128x32xf32>
    %36 = vector.shape_cast %35 : vector<1x128x32xf32> to vector<128x32xf32>
    %37 = arith.addf %34, %36 : vector<128x32xf32>
    %cst_38 = arith.constant dense<0.000000e+00> : vector<128x64xf32>
    %38 = tpu.matmul %37, %3, %cst_38 {dimension_numbers = #tpu.dot_dimension_numbers<[1], [0], [0], [1], [0, 0, 1, 1], [], []>} : vector<128x32xf32>, vector<32x64xf32>, vector<128x64xf32> -> vector<128x64xf32>
    %39 = vector.broadcast %7 : vector<1x64xf32> to vector<128x64xf32>
    %40 = arith.addf %38, %39 : vector<128x64xf32>
    %cst_39 = arith.constant 0.000000e+00 : f32
    %41 = vector.broadcast %cst_39 : f32 to vector<128x64xf32>
    %42 = arith.maximumf %40, %41 : vector<128x64xf32>
    %cst_40 = arith.constant dense<0.000000e+00> : vector<128x32xf32>
    %43 = tpu.matmul %42, %11, %cst_40 {dimension_numbers = #tpu.dot_dimension_numbers<[1], [0], [0], [1], [0, 0, 1, 1], [], []>} : vector<128x64xf32>, vector<64x32xf32>, vector<128x32xf32> -> vector<128x32xf32>
    %44 = vector.broadcast %15 : vector<1x32xf32> to vector<128x32xf32>
    %45 = arith.addf %43, %44 : vector<128x32xf32>
    %c0_41 = arith.constant 0 : index
    %c0_42 = arith.constant 0 : index
    %c0_43 = arith.constant 0 : index
    %46 = vector.load %arg8[%c0_41, %c0_42, %c0_43] : memref<2x8x128xf32, #tpu.memory_space<vmem>>, vector<1x8x128xf32>
    %47 = vector.shape_cast %46 : vector<1x8x128xf32> to vector<8x128xf32>
    %cst_44 = arith.constant dense<0.000000e+00> : vector<8x32xf32>
    %48 = tpu.matmul %47, %45, %cst_44 {dimension_numbers = #tpu.dot_dimension_numbers<[1], [0], [0], [1], [0, 0, 1, 1], [], []>} : vector<8x128xf32>, vector<128x32xf32>, vector<8x32xf32> -> vector<8x32xf32>
    %c128 = arith.constant 128 : index
    %c0_45 = arith.constant 0 : index
    %49 = vector.load %arg1[%c128, %c0_45] : memref<256x32xf32, #tpu.memory_space<vmem>>, vector<128x32xf32>
    %c1_46 = arith.constant 1 : index
    %c0_47 = arith.constant 0 : index
    %c0_48 = arith.constant 0 : index
    %50 = vector.load %arg2[%c1_46, %c0_47, %c0_48] : memref<2x128x128xbf16, #tpu.memory_space<vmem>>, vector<1x128x128xbf16>
    %51 = vector.shape_cast %50 : vector<1x128x128xbf16> to vector<128x128xbf16>
    %52 = arith.extf %51 : vector<128x128xbf16> to vector<128x128xf32>
    %cst_49 = arith.constant dense<0.000000e+00> : vector<128x32xf32>
    %53 = tpu.matmul %52, %49, %cst_49 {dimension_numbers = #tpu.dot_dimension_numbers<[1], [0], [0], [1], [0, 0, 1, 1], [], []>} : vector<128x128xf32>, vector<128x32xf32>, vector<128x32xf32> -> vector<128x32xf32>
    %c0_50 = arith.constant 0 : index
    %c128_51 = arith.constant 128 : index
    %c0_52 = arith.constant 0 : index
    %54 = vector.load %arg3[%c0_50, %c128_51, %c0_52] : memref<2x256x32xf32, #tpu.memory_space<vmem>>, vector<1x128x32xf32>
    %55 = vector.shape_cast %54 : vector<1x128x32xf32> to vector<128x32xf32>
    %56 = arith.addf %53, %55 : vector<128x32xf32>
    %cst_53 = arith.constant dense<0.000000e+00> : vector<128x64xf32>
    %57 = tpu.matmul %56, %1, %cst_53 {dimension_numbers = #tpu.dot_dimension_numbers<[1], [0], [0], [1], [0, 0, 1, 1], [], []>} : vector<128x32xf32>, vector<32x64xf32>, vector<128x64xf32> -> vector<128x64xf32>
    %58 = vector.broadcast %5 : vector<1x64xf32> to vector<128x64xf32>
    %59 = arith.addf %57, %58 : vector<128x64xf32>
    %cst_54 = arith.constant 0.000000e+00 : f32
    %60 = vector.broadcast %cst_54 : f32 to vector<128x64xf32>
    %61 = arith.maximumf %59, %60 : vector<128x64xf32>
    %cst_55 = arith.constant dense<0.000000e+00> : vector<128x32xf32>
    %62 = tpu.matmul %61, %9, %cst_55 {dimension_numbers = #tpu.dot_dimension_numbers<[1], [0], [0], [1], [0, 0, 1, 1], [], []>} : vector<128x64xf32>, vector<64x32xf32>, vector<128x32xf32> -> vector<128x32xf32>
    %63 = vector.broadcast %13 : vector<1x32xf32> to vector<128x32xf32>
    %64 = arith.addf %62, %63 : vector<128x32xf32>
    %cst_56 = arith.constant 0.000000e+00 : f32
    %65 = vector.broadcast %cst_56 : f32 to vector<128x32xf32>
    %66 = arith.maximumf %64, %65 : vector<128x32xf32>
    %cst_57 = arith.constant dense<0.000000e+00> : vector<128x32xf32>
    %67 = tpu.matmul %52, %66, %cst_57 {dimension_numbers = #tpu.dot_dimension_numbers<[1], [0], [0], [1], [0, 0, 1, 1], [], []>} : vector<128x128xf32>, vector<128x32xf32>, vector<128x32xf32> -> vector<128x32xf32>
    %c1_58 = arith.constant 1 : index
    %c128_59 = arith.constant 128 : index
    %c0_60 = arith.constant 0 : index
    %68 = vector.load %arg3[%c1_58, %c128_59, %c0_60] : memref<2x256x32xf32, #tpu.memory_space<vmem>>, vector<1x128x32xf32>
    %69 = vector.shape_cast %68 : vector<1x128x32xf32> to vector<128x32xf32>
    %70 = arith.addf %67, %69 : vector<128x32xf32>
    %cst_61 = arith.constant dense<0.000000e+00> : vector<128x64xf32>
    %71 = tpu.matmul %70, %3, %cst_61 {dimension_numbers = #tpu.dot_dimension_numbers<[1], [0], [0], [1], [0, 0, 1, 1], [], []>} : vector<128x32xf32>, vector<32x64xf32>, vector<128x64xf32> -> vector<128x64xf32>
    %72 = vector.broadcast %7 : vector<1x64xf32> to vector<128x64xf32>
    %73 = arith.addf %71, %72 : vector<128x64xf32>
    %cst_62 = arith.constant 0.000000e+00 : f32
    %74 = vector.broadcast %cst_62 : f32 to vector<128x64xf32>
    %75 = arith.maximumf %73, %74 : vector<128x64xf32>
    %cst_63 = arith.constant dense<0.000000e+00> : vector<128x32xf32>
    %76 = tpu.matmul %75, %11, %cst_63 {dimension_numbers = #tpu.dot_dimension_numbers<[1], [0], [0], [1], [0, 0, 1, 1], [], []>} : vector<128x64xf32>, vector<64x32xf32>, vector<128x32xf32> -> vector<128x32xf32>
    %77 = vector.broadcast %15 : vector<1x32xf32> to vector<128x32xf32>
    %78 = arith.addf %76, %77 : vector<128x32xf32>
    %c1_64 = arith.constant 1 : index
    %c0_65 = arith.constant 0 : index
    %c0_66 = arith.constant 0 : index
    %79 = vector.load %arg8[%c1_64, %c0_65, %c0_66] : memref<2x8x128xf32, #tpu.memory_space<vmem>>, vector<1x8x128xf32>
    %80 = vector.shape_cast %79 : vector<1x8x128xf32> to vector<8x128xf32>
    %cst_67 = arith.constant dense<0.000000e+00> : vector<8x32xf32>
    %81 = tpu.matmul %80, %78, %cst_67 {dimension_numbers = #tpu.dot_dimension_numbers<[1], [0], [0], [1], [0, 0, 1, 1], [], []>} : vector<8x128xf32>, vector<128x32xf32>, vector<8x32xf32> -> vector<8x32xf32>
    %82 = tpu.concatenate %48, %81 in 0 : vector<8x32xf32>, vector<8x32xf32> -> vector<16x32xf32>
    %c0_68 = arith.constant 0 : index
    %c0_69 = arith.constant 0 : index
    %83 = vector.load %arg9[%c0_68, %c0_69] : memref<16x32xf32, #tpu.memory_space<vmem>>, vector<16x32xf32>
    tpu.vector_store %arg9[%c0_68, %c0_69], %82 {strides = array<i32>} : memref<16x32xf32, #tpu.memory_space<vmem>>, vector<16x32xf32>,
    return
  }
  func.func @transform_0(%arg0: i32) -> (i32, i32) {
    %c0_i32 = arith.constant 0 : i32
    %c0_i32_0 = arith.constant 0 : i32
    return %arg0, %c0_i32 : i32, i32
  }
  func.func @transform_1(%arg0: i32) -> (i32, i32, i32) {
    %c0_i32 = arith.constant 0 : i32
    %c0_i32_0 = arith.constant 0 : i32
    %c0_i32_1 = arith.constant 0 : i32
    return %arg0, %c0_i32, %c0_i32_0 : i32, i32, i32
  }
  func.func @transform_2(%arg0: i32) -> (i32, i32, i32) {
    %c0_i32 = arith.constant 0 : i32
    %c0_i32_0 = arith.constant 0 : i32
    %c0_i32_1 = arith.constant 0 : i32
    return %c0_i32, %arg0, %c0_i32_0 : i32, i32, i32
  }
  func.func @transform_3(%arg0: i32) -> (i32, i32, i32) {
    %c0_i32 = arith.constant 0 : i32
    %c0_i32_0 = arith.constant 0 : i32
    %c0_i32_1 = arith.constant 0 : i32
    %c0_i32_2 = arith.constant 0 : i32
    return %c0_i32, %c0_i32_0, %c0_i32_1 : i32, i32, i32
  }
  func.func @transform_4(%arg0: i32) -> (i32, i32, i32) {
    %c0_i32 = arith.constant 0 : i32
    %c0_i32_0 = arith.constant 0 : i32
    %c0_i32_1 = arith.constant 0 : i32
    %c0_i32_2 = arith.constant 0 : i32
    return %c0_i32, %c0_i32_0, %c0_i32_1 : i32, i32, i32
  }
  func.func @transform_5(%arg0: i32) -> (i32, i32, i32) {
    %c0_i32 = arith.constant 0 : i32
    %c0_i32_0 = arith.constant 0 : i32
    %c0_i32_1 = arith.constant 0 : i32
    %c0_i32_2 = arith.constant 0 : i32
    return %c0_i32, %c0_i32_0, %c0_i32_1 : i32, i32, i32
  }
  func.func @transform_6(%arg0: i32) -> (i32, i32, i32) {
    %c0_i32 = arith.constant 0 : i32
    %c0_i32_0 = arith.constant 0 : i32
    %c0_i32_1 = arith.constant 0 : i32
    %c0_i32_2 = arith.constant 0 : i32
    return %c0_i32, %c0_i32_0, %c0_i32_1 : i32, i32, i32
  }
  func.func @transform_7(%arg0: i32) -> (i32, i32, i32) {
    %c0_i32 = arith.constant 0 : i32
    %c0_i32_0 = arith.constant 0 : i32
    %c0_i32_1 = arith.constant 0 : i32
    return %arg0, %c0_i32, %c0_i32_0 : i32, i32, i32
  }
  func.func @transform_8(%arg0: i32) -> (i32, i32) {
    %c0_i32 = arith.constant 0 : i32
    %c0_i32_0 = arith.constant 0 : i32
    return %arg0, %c0_i32 : i32, i32
  }
}

</mosaic_0001>

<bundles_post_ra>
// kernel: tpu_custom_call.1
= control target key start
LH: loop header
LB: loop body
LE: loop exit
PB: predicated region body
PF: predicated region fallthrough
CT: control target
= control target key end

     0   :  { %13 = vsyncpa [#allocation4], 0  ;;  %s3687_s0 = inlined_call_operand.vmem [shape: f32[512,32], index: 0, kind: input, shape index: {}]   ;;  %s3688_s1 = inlined_call_operand.vmem [shape: bf16[4,128,128], index: 1, kind: input, shape index: {}]   ;;  %s3689_s2 = inlined_call_operand.vmem [shape: f32[2,512,32], index: 2, kind: input, shape index: {}]   ;;  %s3690_s3 = inlined_call_operand.vmem [shape: f32[2,32,64], index: 3, kind: input, shape index: {}]   ;;  %s3691_s4 = inlined_call_operand.vmem [shape: f32[2,1,64], index: 4, kind: input, shape index: {}]   ;;  %s3692_s5 = inlined_call_operand.vmem [shape: f32[2,64,32], index: 5, kind: input, shape index: {}]   ;;  %s3693_s6 = inlined_call_operand.vmem [shape: f32[2,1,32], index: 6, kind: input, shape index: {}]   ;;  %s3694_s7 = inlined_call_operand.vmem [shape: f32[4,8,128], index: 7, kind: input, shape index: {}]   ;;  %s3695_s8 = inlined_call_operand.hbm [shape: f32[32,32], index: 8, kind: output, shape index: {}]  }
   0x1   :  { %15 = vsyncpa [#allocation4 + $0x1], 0  ;;  %s2757_s27 = smov 0   ;;  %s2759_s28 = smov 0  }
   0x2   :  { %s2761_s29 = smov 0   ;;  %s2763_s30 = smov 0  }
   0x3 LB: > { %s2778_s9 = sadd.s32 4294967295, %s2708_s30   ;;  %s2296_s10 = sadd.s32 4294967294, %s2708_s30   ;;  %s2708_s30 = sphi %s2763_s30, %s3701_s30   ;;  %s2704_s29 = sphi %s2761_s29, %s3700_s29   ;;  %s2700_s28 = sphi %s2759_s28, %s3699_s28   ;;  %s2696_s27 = sphi %s2757_s27, %s3698_s27  }
   0x4   : > { %s2782_s11 = sadd.s32 1, %s2708_s30   ;;  %s80_s12 = sadd.s32 1, %s2704_s29 }
   0x5   : > { %s77_s13 = ssub.s32 %s2708_s30, %s2782_s11  ;;  %p87_p0 = scmp.ne.s32.totalorder %s2704_s29, %s2700_s28 }
   0x6   : > { %p78_p1 = scmp.eq.s32.totalorder %s77_s13, 0  ;;  %p88_p2 = scmp.eq.s32.totalorder %s2708_s30, 0 }
   0x7   : > { %p227_p3 = scmp.eq.s32.totalorder %s2778_s9, 1  ;;  %p232_p4 = scmp.ne.s32.totalorder %s2700_s28, %s2696_s27 }
   0x8   : > { %s2794_s14 = scalar_select %p78_p1, %s2704_s29, %s80_s12  }
   0x9   : > { %p89_p5 = por %p88_p2, %p87_p0  ;;  %p2796_p6 = por %p227_p3, %p87_p0 }
   0xa   : > { %p233_p7 = scmp.eq.s32.totalorder %s2296_s10, 1  ;;  %p2298_p9 = scmp.ge.s32.totalorder %s2708_s30, 2 }
   0xc   : > { %p2800_p8 = por %p233_p7, %p232_p4  ;;  %261 = sbr.rel (%p2298_p9) target bundleno = 85 (0x55), region = 32 }
  0x11   : > { %283 = sbr.rel (!%p89_p5) target bundleno = 85 (0x55), region = 44  ;;  %s285_s17 = sand.u32 (%p89_p5), 1, %s2704_s29  }
  0x12   : > { %s2508_s18 = sshll.u32 (%p89_p5), %s2708_s30, 8  ;;  %s2299_s19 = sshll.u32 (%p89_p5), %s285_s17, 9 }
  0x13   : > { %s2812_s22 = scalar_lea.vmem (%p89_p5), %s3689_s2, %s2508_s18  ;;  %s2817_s23 = scalar_lea.vmem (%p89_p5), [#allocation2], %s2299_s19 }
  0x14   : > { %v445_v0 = vld [vmem:[%s2812_s22] sm:$0xff] (%p89_p5)  ;;  %v447_v1 = vld [vmem:[%s2812_s22 + $0x8] sm:$0xff] (%p89_p5)  ;;  %v449_v2 = vld [vmem:[%s2812_s22 + $0x10] sm:$0xff] (%p89_p5) }
  0x15   : > { %446 = vst [vmem:[%s2817_s23] sm:$0xff] (%p89_p5), %v445_v0  ;;  %v451_v3 = vld [vmem:[%s2812_s22 + $0x18] sm:$0xff] (%p89_p5)  ;;  %v453_v4 = vld [vmem:[%s2812_s22 + $0x20] sm:$0xff] (%p89_p5)  ;;  %v455_v5 = vld [vmem:[%s2812_s22 + $0x28] sm:$0xff] (%p89_p5) }
  0x16   : > { %448 = vst [vmem:[%s2817_s23 + $0x8] sm:$0xff] %v447_v1  ;;  %v457_v6 = vld [vmem:[%s2812_s22 + $0x30] sm:$0xff]  ;;  %v459_v7 = vld [vmem:[%s2812_s22 + $0x38] sm:$0xff]  ;;  %v461_v8 = vld [vmem:[%s2812_s22 + $0x40] sm:$0xff] }
  0x17   : > { %450 = vst [vmem:[%s2817_s23 + $0x10] sm:$0xff] %v449_v2  ;;  %v463_v9 = vld [vmem:[%s2812_s22 + $0x48] sm:$0xff]  ;;  %v465_v10 = vld [vmem:[%s2812_s22 + $0x50] sm:$0xff]  ;;  %v467_v11 = vld [vmem:[%s2812_s22 + $0x58] sm:$0xff] }
  0x18   : > { %452 = vst [vmem:[%s2817_s23 + $0x18] sm:$0xff] %v451_v3  ;;  %v469_v12 = vld [vmem:[%s2812_s22 + $0x60] sm:$0xff]  ;;  %v471_v13 = vld [vmem:[%s2812_s22 + $0x68] sm:$0xff]  ;;  %v473_v14 = vld [vmem:[%s2812_s22 + $0x70] sm:$0xff] }
  0x19   : > { %454 = vst [vmem:[%s2817_s23 + $0x20] sm:$0xff] %v453_v4  ;;  %v475_v15 = vld [vmem:[%s2812_s22 + $0x78] sm:$0xff]  ;;  %v477_v16 = vld [vmem:[%s2812_s22 + $0x80] sm:$0xff]  ;;  %v479_v17 = vld [vmem:[%s2812_s22 + $0x88] sm:$0xff] }
  0x1a   : > { %456 = vst [vmem:[%s2817_s23 + $0x28] sm:$0xff] %v455_v5  ;;  %v481_v18 = vld [vmem:[%s2812_s22 + $0x90] sm:$0xff]  ;;  %v483_v19 = vld [vmem:[%s2812_s22 + $0x98] sm:$0xff]  ;;  %v485_v20 = vld [vmem:[%s2812_s22 + $0xa0] sm:$0xff] }
  0x1b   : > { %458 = vst [vmem:[%s2817_s23 + $0x30] sm:$0xff] %v457_v6  ;;  %v487_v21 = vld [vmem:[%s2812_s22 + $0xa8] sm:$0xff]  ;;  %v489_v22 = vld [vmem:[%s2812_s22 + $0xb0] sm:$0xff]  ;;  %v491_v23 = vld [vmem:[%s2812_s22 + $0xb8] sm:$0xff] }
  0x1c   : > { %460 = vst [vmem:[%s2817_s23 + $0x38] sm:$0xff] %v459_v7  ;;  %v493_v24 = vld [vmem:[%s2812_s22 + $0xc0] sm:$0xff]  ;;  %v495_v25 = vld [vmem:[%s2812_s22 + $0xc8] sm:$0xff]  ;;  %v497_v26 = vld [vmem:[%s2812_s22 + $0xd0] sm:$0xff] }
  0x1d   : > { %462 = vst [vmem:[%s2817_s23 + $0x40] sm:$0xff] %v461_v8  ;;  %v499_v27 = vld [vmem:[%s2812_s22 + $0xd8] sm:$0xff]  ;;  %v501_v28 = vld [vmem:[%s2812_s22 + $0xe0] sm:$0xff]  ;;  %v503_v29 = vld [vmem:[%s2812_s22 + $0xe8] sm:$0xff] }
  0x1e   : > { %464 = vst [vmem:[%s2817_s23 + $0x48] sm:$0xff] %v463_v9  ;;  %v505_v30 = vld [vmem:[%s2812_s22 + $0xf0] sm:$0xff]  ;;  %v507_v31 = vld [vmem:[%s2812_s22 + $0xf8] sm:$0xff]  ;;  %v509_v32 = vld [vmem:[%s2812_s22 + $0x200] sm:$0xff] }
  0x1f   : > { %466 = vst [vmem:[%s2817_s23 + $0x50] sm:$0xff] %v465_v10  ;;  %v511_v33 = vld [vmem:[%s2812_s22 + $0x208] sm:$0xff]  ;;  %v513_v34 = vld [vmem:[%s2812_s22 + $0x210] sm:$0xff]  ;;  %v515_v35 = vld [vmem:[%s2812_s22 + $0x218] sm:$0xff] }
  0x20   : > { %468 = vst [vmem:[%s2817_s23 + $0x58] sm:$0xff] %v467_v11  ;;  %v517_v36 = vld [vmem:[%s2812_s22 + $0x220] sm:$0xff]  ;;  %v519_v37 = vld [vmem:[%s2812_s22 + $0x228] sm:$0xff]  ;;  %v521_v38 = vld [vmem:[%s2812_s22 + $0x230] sm:$0xff] }
  0x21   : > { %470 = vst [vmem:[%s2817_s23 + $0x60] sm:$0xff] %v469_v12  ;;  %v523_v39 = vld [vmem:[%s2812_s22 + $0x238] sm:$0xff]  ;;  %v525_v40 = vld [vmem:[%s2812_s22 + $0x240] sm:$0xff]  ;;  %v527_v41 = vld [vmem:[%s2812_s22 + $0x248] sm:$0xff] }
  0x22   : > { %472 = vst [vmem:[%s2817_s23 + $0x68] sm:$0xff] %v471_v13  ;;  %v529_v42 = vld [vmem:[%s2812_s22 + $0x250] sm:$0xff]  ;;  %v531_v43 = vld [vmem:[%s2812_s22 + $0x258] sm:$0xff]  ;;  %v533_v44 = vld [vmem:[%s2812_s22 + $0x260] sm:$0xff] }
  0x23   : > { %474 = vst [vmem:[%s2817_s23 + $0x70] sm:$0xff] %v473_v14  ;;  %v535_v45 = vld [vmem:[%s2812_s22 + $0x268] sm:$0xff]  ;;  %v537_v46 = vld [vmem:[%s2812_s22 + $0x270] sm:$0xff]  ;;  %v539_v47 = vld [vmem:[%s2812_s22 + $0x278] sm:$0xff] }
  0x24   : > { %476 = vst [vmem:[%s2817_s23 + $0x78] sm:$0xff] %v475_v15  ;;  %v541_v48 = vld [vmem:[%s2812_s22 + $0x280] sm:$0xff]  ;;  %v543_v49 = vld [vmem:[%s2812_s22 + $0x288] sm:$0xff]  ;;  %v545_v50 = vld [vmem:[%s2812_s22 + $0x290] sm:$0xff] }
  0x25   : > { %478 = vst [vmem:[%s2817_s23 + $0x80] sm:$0xff] %v477_v16  ;;  %v547_v51 = vld [vmem:[%s2812_s22 + $0x298] sm:$0xff]  ;;  %v549_v52 = vld [vmem:[%s2812_s22 + $0x2a0] sm:$0xff]  ;;  %v551_v53 = vld [vmem:[%s2812_s22 + $0x2a8] sm:$0xff] }
  0x26   : > { %480 = vst [vmem:[%s2817_s23 + $0x88] sm:$0xff] %v479_v17  ;;  %v553_v54 = vld [vmem:[%s2812_s22 + $0x2b0] sm:$0xff]  ;;  %v555_v55 = vld [vmem:[%s2812_s22 + $0x2b8] sm:$0xff]  ;;  %v557_v56 = vld [vmem:[%s2812_s22 + $0x2c0] sm:$0xff] }
  0x27   : > { %482 = vst [vmem:[%s2817_s23 + $0x90] sm:$0xff] %v481_v18  ;;  %v559_v57 = vld [vmem:[%s2812_s22 + $0x2c8] sm:$0xff]  ;;  %v561_v58 = vld [vmem:[%s2812_s22 + $0x2d0] sm:$0xff]  ;;  %v563_v59 = vld [vmem:[%s2812_s22 + $0x2d8] sm:$0xff] }
  0x28   : > { %484 = vst [vmem:[%s2817_s23 + $0x98] sm:$0xff] %v483_v19  ;;  %v565_v60 = vld [vmem:[%s2812_s22 + $0x2e0] sm:$0xff]  ;;  %v567_v61 = vld [vmem:[%s2812_s22 + $0x2e8] sm:$0xff]  ;;  %v569_v62 = vld [vmem:[%s2812_s22 + $0x2f0] sm:$0xff] }
  0x29   : > { %486 = vst [vmem:[%s2817_s23 + $0xa0] sm:$0xff] %v485_v20  ;;  %v571_v63 = vld [vmem:[%s2812_s22 + $0x2f8] sm:$0xff] }
  0x2a   : > { %488 = vst [vmem:[%s2817_s23 + $0xa8] sm:$0xff] %v487_v21 }
  0x2b   : > { %490 = vst [vmem:[%s2817_s23 + $0xb0] sm:$0xff] %v489_v22 }
  0x2c   : > { %492 = vst [vmem:[%s2817_s23 + $0xb8] sm:$0xff] %v491_v23 }
  0x2d   : > { %494 = vst [vmem:[%s2817_s23 + $0xc0] sm:$0xff] %v493_v24 }
  0x2e   : > { %496 = vst [vmem:[%s2817_s23 + $0xc8] sm:$0xff] %v495_v25 }
  0x2f   : > { %498 = vst [vmem:[%s2817_s23 + $0xd0] sm:$0xff] %v497_v26 }
  0x30   : > { %500 = vst [vmem:[%s2817_s23 + $0xd8] sm:$0xff] %v499_v27 }
  0x31   : > { %502 = vst [vmem:[%s2817_s23 + $0xe0] sm:$0xff] %v501_v28 }
  0x32   : > { %504 = vst [vmem:[%s2817_s23 + $0xe8] sm:$0xff] %v503_v29 }
  0x33   : > { %506 = vst [vmem:[%s2817_s23 + $0xf0] sm:$0xff] %v505_v30 }
  0x34   : > { %508 = vst [vmem:[%s2817_s23 + $0xf8] sm:$0xff] %v507_v31 }
  0x35   : > { %510 = vst [vmem:[%s2817_s23 + $0x100] sm:$0xff] %v509_v32 }
  0x36   : > { %512 = vst [vmem:[%s2817_s23 + $0x108] sm:$0xff] %v511_v33 }
  0x37   : > { %514 = vst [vmem:[%s2817_s23 + $0x110] sm:$0xff] %v513_v34 }
  0x38   : > { %516 = vst [vmem:[%s2817_s23 + $0x118] sm:$0xff] %v515_v35 }
  0x39   : > { %518 = vst [vmem:[%s2817_s23 + $0x120] sm:$0xff] %v517_v36 }
  0x3a   : > { %520 = vst [vmem:[%s2817_s23 + $0x128] sm:$0xff] %v519_v37 }
  0x3b   : > { %522 = vst [vmem:[%s2817_s23 + $0x130] sm:$0xff] %v521_v38 }
  0x3c   : > { %524 = vst [vmem:[%s2817_s23 + $0x138] sm:$0xff] %v523_v39 }
  0x3d   : > { %526 = vst [vmem:[%s2817_s23 + $0x140] sm:$0xff] %v525_v40 }
  0x3e   : > { %528 = vst [vmem:[%s2817_s23 + $0x148] sm:$0xff] %v527_v41 }
  0x3f   : > { %530 = vst [vmem:[%s2817_s23 + $0x150] sm:$0xff] %v529_v42 }
  0x40   : > { %532 = vst [vmem:[%s2817_s23 + $0x158] sm:$0xff] %v531_v43 }
  0x41   : > { %534 = vst [vmem:[%s2817_s23 + $0x160] sm:$0xff] %v533_v44 }
  0x42   : > { %536 = vst [vmem:[%s2817_s23 + $0x168] sm:$0xff] %v535_v45 }
  0x43   : > { %538 = vst [vmem:[%s2817_s23 + $0x170] sm:$0xff] %v537_v46 }
  0x44   : > { %540 = vst [vmem:[%s2817_s23 + $0x178] sm:$0xff] %v539_v47 }
  0x45   : > { %542 = vst [vmem:[%s2817_s23 + $0x180] sm:$0xff] %v541_v48 }
  0x46   : > { %544 = vst [vmem:[%s2817_s23 + $0x188] sm:$0xff] %v543_v49 }
  0x47   : > { %546 = vst [vmem:[%s2817_s23 + $0x190] sm:$0xff] %v545_v50 }
  0x48   : > { %548 = vst [vmem:[%s2817_s23 + $0x198] sm:$0xff] %v547_v51 }
  0x49   : > { %550 = vst [vmem:[%s2817_s23 + $0x1a0] sm:$0xff] %v549_v52 }
  0x4a   : > { %552 = vst [vmem:[%s2817_s23 + $0x1a8] sm:$0xff] %v551_v53 }
  0x4b   : > { %554 = vst [vmem:[%s2817_s23 + $0x1b0] sm:$0xff] %v553_v54 }
  0x4c   : > { %556 = vst [vmem:[%s2817_s23 + $0x1b8] sm:$0xff] %v555_v55 }
  0x4d   : > { %558 = vst [vmem:[%s2817_s23 + $0x1c0] sm:$0xff] %v557_v56 }
  0x4e   : > { %560 = vst [vmem:[%s2817_s23 + $0x1c8] sm:$0xff] %v559_v57 }
  0x4f   : > { %562 = vst [vmem:[%s2817_s23 + $0x1d0] sm:$0xff] %v561_v58 }
  0x50   : > { %564 = vst [vmem:[%s2817_s23 + $0x1d8] sm:$0xff] %v563_v59 }
  0x51   : > { %566 = vst [vmem:[%s2817_s23 + $0x1e0] sm:$0xff] %v565_v60 }
  0x52   : > { %568 = vst [vmem:[%s2817_s23 + $0x1e8] sm:$0xff] %v567_v61 }
  0x53   : > { %570 = vst [vmem:[%s2817_s23 + $0x1f0] sm:$0xff] %v569_v62 }
  0x54   : > { %572 = vst [vmem:[%s2817_s23 + $0x1f8] sm:$0xff] %v571_v63 }
  0x55 PF: > { %p2302_p10 = scmp.ge.s32.totalorder %s2708_s30, 1  ;;  %p586_p11 = scmp.lt.s32.totalorder %s2708_s30, 3 }
  0x57   : > { %p587_p12 = pnand %p2302_p10, %p586_p11 }
  0x58   : > { %s2305_s24 = sshll.u32 (!%p587_p12), %s2778_s9, 5  ;;  %s2307_s13 = sshll.u32 (!%p587_p12), %s2778_s9, 1 }
  0x59   : > { %590 = sbr.rel (%p587_p12) target bundleno = 2199 (0x897), region = 86  ;;  %p643_p13 = scmp.lt.s32.totalorder (!%p587_p12), %s2305_s24, 63 }
  0x5a   : > { %p649_p0 = scmp.lt.s32.totalorder (!%p587_p12), %s2307_s13, 3  ;;  %s3059_s18 = sand.u32 (!%p587_p12), 1, %s2700_s28  }
  0x5b   : > { %s2303_s19 = sshll.u32 (!%p587_p12), %s3059_s18, 9  ;;  %s2510_s26 = sshll.u32 (!%p587_p12), %s2778_s9, 4 }
  0x5c   : > { %s3065_s21 = scalar_lea.vmem (!%p587_p12), [#allocation2], %s2303_s19  ;;  %s2304_s19 = sshll.u32 (!%p587_p12), %s3059_s18, 4 }
  0x5d   : > { %s3529_s22 = scalar_lea.vmem (!%p587_p12), [#allocation3], %s2304_s19 }
  0x5e   : > { %s3703_s24 = smov (!%p643_p13, %s2305_s24), 63  ;;  %s3705_s13 = smov (!%p649_p0, %s2307_s13), 3  ;;  %v666_v34 = vld [vmem:[%s3690_s3 + $0x18] sm:$0xff]  ;;  %v665_v35 = vld [vmem:[%s3690_s3 + $0x10] sm:$0xff]  ;;  %v664_v38 = vld [vmem:[%s3690_s3 + $0x8] sm:$0xff]  ;;  %vm827_vm0 = vcmask 261120  }
  0x5f   : > { %s2306_s25 = sshll.u32 %s3703_s24, 3  ;;  %s2509_s17 = sshll.u32 %s3705_s13, 6  ;;  %888 = vmatpush.msra.mxu1 %v666_v34  ;;  %v663_v39 = vld [vmem:[%s3690_s3] sm:$0xff]  ;;  %v744_v47 = vld [vmem:[%s3065_s21 + $0x8] sm:$0xff]  ;;  %v745_v50 = vld [vmem:[%s3065_s21 + $0x10] sm:$0xff]  ;;  %vm960_vm1 = vcmask 523264  }
  0x60   : > { %s2950_s12 = scalar_lea.vmem %s3687_s0, %s2306_s25  ;;  %s2972_s20 = scalar_lea.vmem %s3688_s1, %s2509_s17  ;;  %v743_v44 = vld [vmem:[%s3065_s21] sm:$0xff]  ;;  %v746_v53 = vld [vmem:[%s3065_s21 + $0x18] sm:$0xff]  ;;  %v748_v59 = vld [vmem:[%s3065_s21 + $0x28] sm:$0xff] }
  0x61   : > { %v710_v0 = vld [vmem:[%s2950_s12 + $0x78] sm:$0xff]  ;;  %v709_v1 = vld [vmem:[%s2950_s12 + $0x70] sm:$0xff]  ;;  %v708_v2 = vld [vmem:[%s2950_s12 + $0x68] sm:$0xff]  ;;  %889 = vmatpush.msra.mxu1 %v665_v35  ;;  %s2311_s17 = sshll.u32 %s3705_s13, 3  ;;  %s2177_s13 = scalar_lea.sflag [#allocation4], %s3059_s18 }
  0x62   : > { %759 = vmatpush.msra.mxu0 %v710_v0  ;;  %v707_v3 = vld [vmem:[%s2950_s12 + $0x60] sm:$0xff]  ;;  %v706_v4 = vld [vmem:[%s2950_s12 + $0x58] sm:$0xff]  ;;  %v705_v5 = vld [vmem:[%s2950_s12 + $0x50] sm:$0xff]  ;;  %s3480_s23 = scalar_lea.vmem %s3694_s7, %s2311_s17  ;;  %s2189_s17 = sshll.u32 %s3529_s22, 4  ;;  %s2190_s17 = int_to_ptr.vmem [resolvable:$true] %s2189_s17 }
  0x63   : > { %v704_v6 = vld [vmem:[%s2950_s12 + $0x48] sm:$0xff]  ;;  %v703_v7 = vld [vmem:[%s2950_s12 + $0x40] sm:$0xff]  ;;  %v702_v8 = vld [vmem:[%s2950_s12 + $0x38] sm:$0xff]  ;;  %890 = vmatpush.msra.mxu1 %v664_v38  ;;  %s2666_s25 = scalar_lea.hbm %s3695_s8, 32 }
  0x64   : > { %760 = vmatpush.msra.mxu0 %v709_v1  ;;  %v701_v9 = vld [vmem:[%s2950_s12 + $0x30] sm:$0xff]  ;;  %v700_v10 = vld [vmem:[%s2950_s12 + $0x28] sm:$0xff]  ;;  %v699_v11 = vld [vmem:[%s2950_s12 + $0x20] sm:$0xff] }
  0x65   : > { %v698_v12 = vld [vmem:[%s2950_s12 + $0x18] sm:$0xff]  ;;  %v697_v13 = vld [vmem:[%s2950_s12 + $0x10] sm:$0xff]  ;;  %v2976_v14 = vld [vmem:[%s2972_s20] sm:$0xff]   ;;  %891 = vmatpush.msra.mxu1 %v663_v39 }
  0x66   : > { %761 = vmatpush.msra.mxu0 %v708_v2  ;;  %v696_v15 = vld [vmem:[%s2950_s12 + $0x8] sm:$0xff]  ;;  %v695_v16 = vld [vmem:[%s2950_s12] sm:$0xff]  ;;  %v2513_v17 = vunpack.c.l.bf16 %v2976_v14  ;;  %v2514_v18 = vunpack.c.h.bf16 %v2976_v14  ;;  %v2996_v22 = vld [vmem:[%s2972_s20 + $0x10] sm:$0xff]  }
  0x67   : > { %v2987_v19 = vld [vmem:[%s2972_s20 + $0x8] sm:$0xff]   ;;  %v2521_v23 = vunpack.c.l.bf16 %v2996_v22  ;;  %v2522_v24 = vunpack.c.h.bf16 %v2996_v22  ;;  %v3005_v25 = vld [vmem:[%s2972_s20 + $0x18] sm:$0xff]   ;;  %v3014_v28 = vld [vmem:[%s2972_s20 + $0x20] sm:$0xff]  }
  0x68   : > { %762 = vmatpush.msra.mxu0 %v707_v3  ;;  %v2517_v20 = vunpack.c.l.bf16 %v2987_v19  ;;  %v2518_v21 = vunpack.c.h.bf16 %v2987_v19  ;;  %v2525_v26 = vunpack.c.l.bf16 %v3005_v25  ;;  %v2526_v27 = vunpack.c.h.bf16 %v3005_v25  ;;  %v3023_v31 = vld [vmem:[%s2972_s20 + $0x28] sm:$0xff]   ;;  %v3038_v36 = vld [vmem:[%s2972_s20 + $0x30] sm:$0xff]   ;;  %v3053_v41 = vld [vmem:[%s2972_s20 + $0x38] sm:$0xff]  }
  0x69   : > { %v2529_v29 = vunpack.c.l.bf16 %v3014_v28  ;;  %v2530_v30 = vunpack.c.h.bf16 %v3014_v28  ;;  %v2533_v32 = vunpack.c.l.bf16 %v3023_v31  ;;  %v2534_v33 = vunpack.c.h.bf16 %v3023_v31  ;;  %v747_v56 = vld [vmem:[%s3065_s21 + $0x20] sm:$0xff]  ;;  %v749_v62 = vld [vmem:[%s3065_s21 + $0x30] sm:$0xff]  ;;  %v750_v1 = vld [vmem:[%s3065_s21 + $0x38] sm:$0xff] }
  0x6a   : > { %763 = vmatpush.msra.mxu0 %v706_v4  ;;  %v2537_v37 = vunpack.c.l.bf16 %v3038_v36  ;;  %v2538_v40 = vunpack.c.h.bf16 %v3038_v36  ;;  %v2541_v42 = vunpack.c.l.bf16 %v3053_v41  ;;  %v2542_v43 = vunpack.c.h.bf16 %v3053_v41  ;;  %v751_v4 = vld [vmem:[%s3065_s21 + $0x40] sm:$0xff]  ;;  %v3186_v14 = vld [vmem:[%s3690_s3 + $0x38] sm:$0xff] }
  0x6b   : > { %1235 = vmatpush.msrb.mxu1 %v3186_v14  ;;  %v3210_v19 = vld [vmem:[%s3690_s3 + $0x20] sm:$0xff] }
  0x6c   : > { %764 = vmatpush.msra.mxu0 %v705_v5 }
  0x6e   : > { %765 = vmatpush.msra.mxu0 %v704_v6 }
  0x70   : > { %766 = vmatpush.msra.mxu0 %v703_v7  ;;  %v752_v7 = vld [vmem:[%s3065_s21 + $0x48] sm:$0xff] }
  0x72   : > { %767 = vmatpush.msra.mxu0 %v702_v8 }
  0x74   : > { %768 = vmatpush.msra.mxu0 %v701_v9 }
  0x76   : > { %769 = vmatpush.msra.mxu0 %v700_v10  ;;  %v753_v10 = vld [vmem:[%s3065_s21 + $0x50] sm:$0xff] }
  0x78   : > { %770 = vmatpush.msra.mxu0 %v699_v11 }
  0x7a   : > { %771 = vmatpush.msra.mxu0 %v698_v12 }
  0x7c   : > { %772 = vmatpush.msra.mxu0 %v697_v13  ;;  %v682_v13 = vld [vmem:[%s3692_s5 + $0x38] sm:$0xff] }
  0x7d   : > { %1017 = vmatpush.msra.mxu2 %v682_v13 }
  0x7e   : > { %773 = vmatpush.msra.mxu0 %v696_v15  ;;  %v754_v15 = vld [vmem:[%s3065_s21 + $0x58] sm:$0xff] }
  0x80   : > { %774 = vmatpush.msra.mxu0 %v695_v16  ;;  %v681_v16 = vld [vmem:[%s3692_s5 + $0x30] sm:$0xff] }
  0x81   : > { %775 = vmatmul.f32.vlgmr.msra.gmra.mxu0 %v2513_v17  ;;  %1018 = vmatpush.msra.mxu2 %v681_v16 }
  0x82   : > { %1631 = vmatpush.msrb.mxu0 %v666_v34 }
  0x84   : > { %1632 = vmatpush.msrb.mxu0 %v665_v35 }
  0x86   : > { %1633 = vmatpush.msrb.mxu0 %v664_v38  ;;  %v680_v38 = vld [vmem:[%s3692_s5 + $0x28] sm:$0xff] }
  0x87   : > { %1019 = vmatpush.msra.mxu2 %v680_v38 }
  0x88   : > { %1634 = vmatpush.msrb.mxu0 %v663_v39  ;;  %v679_v39 = vld [vmem:[%s3692_s5 + $0x20] sm:$0xff] }
  0x89   : > { %778 = vmatmul.f32.gmra.mxu0 %v2514_v18  ;;  %1020 = vmatpush.msra.mxu2 %v679_v39 }
  0x91   : > { %781 = vmatmul.f32.gmra.mxu0 %v2517_v20 }
  0x99   : > { %784 = vmatmul.f32.gmra.mxu0 %v2518_v21 }
  0xa1   : > { %787 = vmatmul.f32.gmra.mxu0 %v2521_v23 }
  0xa9   : > { %790 = vmatmul.f32.gmra.mxu0 %v2522_v24 }
  0xb1   : > { %793 = vmatmul.f32.gmra.mxu0 %v2525_v26 }
  0xb9   : > { %796 = vmatmul.f32.gmra.mxu0 %v2526_v27 }
  0xc1   : > { %799 = vmatmul.f32.gmra.mxu0 %v2529_v29 }
  0xc9   : > { %802 = vmatmul.f32.gmra.mxu0 %v2530_v30 }
  0xd1   : > { %805 = vmatmul.f32.gmra.mxu0 %v2533_v32 }
  0xd9   : > { %808 = vmatmul.f32.gmra.mxu0 %v2534_v33 }
  0xe1   : > { %811 = vmatmul.f32.gmra.mxu0 %v2537_v37 }
  0xe9   : > { %814 = vmatmul.f32.gmra.mxu0 %v2538_v40 }
  0xf1   : > { %817 = vmatmul.f32.gmra.mxu0 %v2541_v42 }
  0xf9   : > { %820 = vmatmul.f32.gmra.mxu0 %v2542_v43 }
  0xfe   : > { %v776_v45 = vpop.f32.mrf.mxu0 }
  0xff   : > { %v777_v46 = vadd.f32 %v776_v45, %v743_v44  ;;  %v678_v44 = vld [vmem:[%s3692_s5 + $0x18] sm:$0xff]  ;;  %v755_v45 = vld [vmem:[%s3065_s21 + $0x60] sm:$0xff] }
 0x100   : > { %1021 = vmatpush.msra.mxu2 %v678_v44 }
 0x101   : > { %2326 = vmatmul.msk.f32.vlgmr.msra.gmra.mxu1 %vm827_vm0, %v777_v46  ;;  %v677_v46 = vld [vmem:[%s3692_s5 + $0x10] sm:$0xff] }
 0x102   : > { %1022 = vmatpush.msra.mxu2 %v677_v46 }
 0x106   : > { %v779_v48 = vpop.f32.mrf.mxu0 }
 0x107   : > { %v780_v49 = vadd.f32 %v779_v48, %v744_v47 }
 0x109   : > { %2327 = vmatmul.msk.f32.gmra.mxu1 %vm827_vm0, %v780_v49  ;;  %v676_v49 = vld [vmem:[%s3692_s5 + $0x8] sm:$0xff] }
 0x10a   : > { %1023 = vmatpush.msra.mxu2 %v676_v49 }
 0x10e   : > { %v782_v51 = vpop.f32.mrf.mxu0 }
 0x10f   : > { %v783_v52 = vadd.f32 %v782_v51, %v745_v50  ;;  %v675_v50 = vld [vmem:[%s3692_s5] sm:$0xff]  ;;  %v756_v51 = vld [vmem:[%s3065_s21 + $0x68] sm:$0xff] }
 0x110   : > { %1024 = vmatpush.msra.mxu2 %v675_v50 }
 0x111   : > { %2328 = vmatmul.msk.f32.gmra.mxu1 %vm827_vm0, %v783_v52 }
 0x116   : > { %v785_v54 = vpop.f32.mrf.mxu0 }
 0x117   : > { %v786_v55 = vadd.f32 %v785_v54, %v746_v53  ;;  %v757_v54 = vld [vmem:[%s3065_s21 + $0x70] sm:$0xff] }
 0x119   : > { %2329 = vmatmul.msk.f32.gmra.mxu1 %vm827_vm0, %v786_v55 }
 0x11e   : > { %v788_v57 = vpop.f32.mrf.mxu0 }
 0x11f   : > { %v789_v58 = vadd.f32 %v788_v57, %v747_v56  ;;  %v758_v57 = vld [vmem:[%s3065_s21 + $0x78] sm:$0xff] }
 0x121   : > { %2330 = vmatmul.msk.f32.gmra.mxu1 %vm827_vm0, %v789_v58 }
 0x126   : > { %v791_v60 = vpop.f32.mrf.mxu0 }
 0x127   : > { %v792_v61 = vadd.f32 %v791_v60, %v748_v59  ;;  %v3126_v60 = vld [vmem:[%s3691_s4] ss:$0 sm:$0xff] }
 0x129   : > { %2331 = vmatmul.msk.f32.gmra.mxu1 %vm827_vm0, %v792_v61 }
 0x12e   : > { %v794_v63 = vpop.f32.mrf.mxu0 }
 0x12f   : > { %v795_v0 = vadd.f32 %v794_v63, %v749_v62 }
 0x131   : > { %2332 = vmatmul.msk.f32.gmra.mxu1 %vm827_vm0, %v795_v0 }
 0x136   : > { %v797_v2 = vpop.f32.mrf.mxu0 }
 0x137   : > { %v798_v3 = vadd.f32 %v797_v2, %v750_v1 }
 0x139   : > { %2333 = vmatmul.msk.f32.gmra.mxu1 %vm827_vm0, %v798_v3 }
 0x13e   : > { %v800_v5 = vpop.f32.mrf.mxu0 }
 0x13f   : > { %v801_v6 = vadd.f32 %v800_v5, %v751_v4 }
 0x141   : > { %2334 = vmatmul.msk.f32.gmra.mxu1 %vm827_vm0, %v801_v6 }
 0x146   : > { %v803_v8 = vpop.f32.mrf.mxu0 }
 0x147   : > { %v804_v9 = vadd.f32 %v803_v8, %v752_v7 }
 0x149   : > { %2335 = vmatmul.msk.f32.gmra.mxu1 %vm827_vm0, %v804_v9 }
 0x14e   : > { %v806_v11 = vpop.f32.mrf.mxu0 }
 0x14f   : > { %v807_v12 = vadd.f32 %v806_v11, %v753_v10 }
 0x151   : > { %2336 = vmatmul.msk.f32.gmra.mxu1 %vm827_vm0, %v807_v12 }
 0x156   : > { %v809_v34 = vpop.f32.mrf.mxu0 }
 0x157   : > { %v810_v35 = vadd.f32 %v809_v34, %v754_v15 }
 0x159   : > { %2337 = vmatmul.msk.f32.gmra.mxu1 %vm827_vm0, %v810_v35 }
 0x15e   : > { %v812_v47 = vpop.f32.mrf.mxu0 }
 0x15f   : > { %v813_v48 = vadd.f32 %v812_v47, %v755_v45 }
 0x161   : > { %2338 = vmatmul.msk.f32.gmra.mxu1 %vm827_vm0, %v813_v48 }
 0x166   : > { %v815_v52 = vpop.f32.mrf.mxu0 }
 0x167   : > { %v816_v53 = vadd.f32 %v815_v52, %v756_v51 }
 0x169   : > { %2339 = vmatmul.msk.f32.gmra.mxu1 %vm827_vm0, %v816_v53 }
 0x16e   : > { %v818_v55 = vpop.f32.mrf.mxu0 }
 0x16f   : > { %v819_v56 = vadd.f32 %v818_v55, %v757_v54 }
 0x171   : > { %2340 = vmatmul.msk.f32.gmra.mxu1 %vm827_vm0, %v819_v56 }
 0x176   : > { %v821_v58 = vpop.f32.mrf.mxu0 }
 0x177   : > { %v822_v59 = vadd.f32 %v821_v58, %v758_v57 }
 0x179   : > { %2341 = vmatmul.msk.f32.gmra.mxu1 %vm827_vm0, %v822_v59 }
 0x17e   : > { %v893_v61 = vpop.f32.mrf.mxu1 }
 0x17f   : > { %v894_v62 = vadd.f32 %v3126_v60, %v893_v61 }
 0x181   : > { %v941_v63 = vmax.f32 %v894_v62, 0.0 }
 0x183   : > { %2342 = vmatmul.msk.f32.vlgmr.msra.gmra.mxu2 %vm960_vm1, %v941_v63 }
 0x186   : > { %v896_v0 = vpop.f32.mrf.mxu1 }
 0x187   : > { %v897_v1 = vadd.f32 %v3126_v60, %v896_v0 }
 0x189   : > { %v942_v2 = vmax.f32 %v897_v1, 0.0 }
 0x18b   : > { %2343 = vmatmul.msk.f32.gmra.mxu2 %vm960_vm1, %v942_v2 }
 0x18e   : > { %v899_v3 = vpop.f32.mrf.mxu1 }
 0x18f   : > { %v900_v4 = vadd.f32 %v3126_v60, %v899_v3 }
 0x191   : > { %v943_v5 = vmax.f32 %v900_v4, 0.0 }
 0x193   : > { %2344 = vmatmul.msk.f32.gmra.mxu2 %vm960_vm1, %v943_v5 }
 0x196   : > { %v902_v6 = vpop.f32.mrf.mxu1 }
 0x197   : > { %v903_v7 = vadd.f32 %v3126_v60, %v902_v6 }
 0x199   : > { %v944_v8 = vmax.f32 %v903_v7, 0.0 }
 0x19b   : > { %2345 = vmatmul.msk.f32.gmra.mxu2 %vm960_vm1, %v944_v8 }
 0x19e   : > { %v905_v9 = vpop.f32.mrf.mxu1 }
 0x19f   : > { %v906_v10 = vadd.f32 %v3126_v60, %v905_v9 }
 0x1a1   : > { %v945_v11 = vmax.f32 %v906_v10, 0.0 }
 0x1a3   : > { %2346 = vmatmul.msk.f32.gmra.mxu2 %vm960_vm1, %v945_v11 }
 0x1a6   : > { %v908_v12 = vpop.f32.mrf.mxu1 }
 0x1a7   : > { %v909_v13 = vadd.f32 %v3126_v60, %v908_v12 }
 0x1a9   : > { %v946_v15 = vmax.f32 %v909_v13, 0.0 }
 0x1ab   : > { %2347 = vmatmul.msk.f32.gmra.mxu2 %vm960_vm1, %v946_v15 }
 0x1ae   : > { %v911_v16 = vpop.f32.mrf.mxu1 }
 0x1af   : > { %v912_v34 = vadd.f32 %v3126_v60, %v911_v16 }
 0x1b1   : > { %v947_v35 = vmax.f32 %v912_v34, 0.0 }
 0x1b3   : > { %2348 = vmatmul.msk.f32.gmra.mxu2 %vm960_vm1, %v947_v35 }
 0x1b6   : > { %v914_v38 = vpop.f32.mrf.mxu1 }
 0x1b7   : > { %v915_v39 = vadd.f32 %v3126_v60, %v914_v38 }
 0x1b9   : > { %v948_v44 = vmax.f32 %v915_v39, 0.0 }
 0x1bb   : > { %2349 = vmatmul.msk.f32.gmra.mxu2 %vm960_vm1, %v948_v44 }
 0x1be   : > { %v917_v45 = vpop.f32.mrf.mxu1 }
 0x1bf   : > { %v918_v46 = vadd.f32 %v3126_v60, %v917_v45  ;;  %v2632_v45 = vld [vmem:[%s3693_s6] ss:$0 sm:$0xff] }
 0x1c1   : > { %v949_v47 = vmax.f32 %v918_v46, 0.0 }
 0x1c3   : > { %2350 = vmatmul.msk.f32.gmra.mxu2 %vm960_vm1, %v949_v47 }
 0x1c6   : > { %v920_v48 = vpop.f32.mrf.mxu1 }
 0x1c7   : > { %v921_v49 = vadd.f32 %v3126_v60, %v920_v48 }
 0x1c9   : > { %v950_v50 = vmax.f32 %v921_v49, 0.0 }
 0x1cb   : > { %2351 = vmatmul.msk.f32.gmra.mxu2 %vm960_vm1, %v950_v50 }
 0x1ce   : > { %v923_v51 = vpop.f32.mrf.mxu1 }
 0x1cf   : > { %v924_v52 = vadd.f32 %v3126_v60, %v923_v51 }
 0x1d1   : > { %v951_v53 = vmax.f32 %v924_v52, 0.0 }
 0x1d3   : > { %2352 = vmatmul.msk.f32.gmra.mxu2 %vm960_vm1, %v951_v53 }
 0x1d6   : > { %v926_v54 = vpop.f32.mrf.mxu1 }
 0x1d7   : > { %v927_v55 = vadd.f32 %v3126_v60, %v926_v54 }
 0x1d9   : > { %v952_v56 = vmax.f32 %v927_v55, 0.0 }
 0x1db   : > { %2353 = vmatmul.msk.f32.gmra.mxu2 %vm960_vm1, %v952_v56 }
 0x1de   : > { %v929_v57 = vpop.f32.mrf.mxu1 }
 0x1df   : > { %v930_v58 = vadd.f32 %v3126_v60, %v929_v57 }
 0x1e1   : > { %v953_v59 = vmax.f32 %v930_v58, 0.0 }
 0x1e3   : > { %2354 = vmatmul.msk.f32.gmra.mxu2 %vm960_vm1, %v953_v59 }
 0x1e6   : > { %v932_v61 = vpop.f32.mrf.mxu1 }
 0x1e7   : > { %v933_v62 = vadd.f32 %v3126_v60, %v932_v61 }
 0x1e9   : > { %v954_v63 = vmax.f32 %v933_v62, 0.0 }
 0x1eb   : > { %2355 = vmatmul.msk.f32.gmra.mxu2 %vm960_vm1, %v954_v63 }
 0x1ee   : > { %v935_v0 = vpop.f32.mrf.mxu1 }
 0x1ef   : > { %v936_v1 = vadd.f32 %v3126_v60, %v935_v0 }
 0x1f1   : > { %v955_v2 = vmax.f32 %v936_v1, 0.0 }
 0x1f3   : > { %2356 = vmatmul.msk.f32.gmra.mxu2 %vm960_vm1, %v955_v2 }
 0x1f6   : > { %v938_v3 = vpop.f32.mrf.mxu1 }
 0x1f7   : > { %v939_v4 = vadd.f32 %v3126_v60, %v938_v3 }
 0x1f9   : > { %v956_v5 = vmax.f32 %v939_v4, 0.0 }
 0x1fb   : > { %2357 = vmatmul.msk.f32.gmra.mxu2 %vm960_vm1, %v956_v5 }
 0x206   : > { %v1026_v6 = vpop.f32.mrf.mxu2 }
 0x20e   : > { %v1029_v7 = vpop.f32.mrf.mxu2 }
 0x216   : > { %v1032_v8 = vpop.f32.mrf.mxu2 }
 0x21e   : > { %v1035_v9 = vpop.f32.mrf.mxu2 }
 0x226   : > { %v1038_v10 = vpop.f32.mrf.mxu2 }
 0x227   : > { %v1039_v4 = vadd.f32 %v2632_v45, %v1038_v10  ;;  %v2366_v10 = vld [vmem:[%s3065_s21 + $0x140] sm:$0xff] }
 0x22e   : > { %v1041_v11 = vpop.f32.mrf.mxu2 }
 0x22f   : > { %v1042_v2 = vadd.f32 %v2632_v45, %v1041_v11 }
 0x236   : > { %v1044_v12 = vpop.f32.mrf.mxu2 }
 0x237   : > { %v1045_v0 = vadd.f32 %v2632_v45, %v1044_v12 }
 0x239   : > { %v1080_v5 = vmax.f32 %v1045_v0, 0.0 }
 0x23e   : > { %v1047_v13 = vpop.f32.mrf.mxu2 }
 0x23f   : > { %v1048_v62 = vadd.f32 %v2632_v45, %v1047_v13 }
 0x241   : > { %v1081_v3 = vmax.f32 %v1048_v62, 0.0  ;;  %v2370_v62 = vld [vmem:[%s3065_s21 + $0x160] sm:$0xff] }
 0x246   : > { %v1050_v15 = vpop.f32.mrf.mxu2 }
 0x247   : > { %v1051_v59 = vadd.f32 %v2632_v45, %v1050_v15  ;;  %v1078_v15 = vmax.f32 %v1039_v4, 0.0  ;;  %v2371_v4 = vld [vmem:[%s3065_s21 + $0x168] sm:$0xff] }
 0x249   : > { %v1082_v1 = vmax.f32 %v1051_v59, 0.0  ;;  %v2321_v59 = vld [vmem:[%s3692_s5 + $0x60] sm:$0xff] }
 0x24e   : > { %v1053_v16 = vpop.f32.mrf.mxu2 }
 0x24f   : > { %v1054_v57 = vadd.f32 %v2632_v45, %v1053_v16  ;;  %v1079_v16 = vmax.f32 %v1042_v2, 0.0  ;;  %v2318_v2 = vld [vmem:[%s3692_s5 + $0x48] sm:$0xff] }
 0x251   : > { %v1083_v63 = vmax.f32 %v1054_v57, 0.0 }
 0x256   : > { %v1056_v34 = vpop.f32.mrf.mxu2 }
 0x257   : > { %v1057_v55 = vadd.f32 %v2632_v45, %v1056_v34  ;;  %v1036_v34 = vadd.f32 %v2632_v45, %v1035_v9 }
 0x259   : > { %v1084_v61 = vmax.f32 %v1057_v55, 0.0  ;;  %v1077_v13 = vmax.f32 %v1036_v34, 0.0  ;;  %v2323_v55 = vld [vmem:[%s3692_s5 + $0x70] sm:$0xff] }
 0x25e   : > { %v1059_v35 = vpop.f32.mrf.mxu2 }
 0x25f   : > { %v1060_v53 = vadd.f32 %v2632_v45, %v1059_v35  ;;  %v1033_v35 = vadd.f32 %v2632_v45, %v1032_v8 }
 0x261   : > { %v1085_v58 = vmax.f32 %v1060_v53, 0.0  ;;  %v1076_v12 = vmax.f32 %v1033_v35, 0.0  ;;  %v1455_v35 = vld [vmem:[%s2950_s12 + $0xf0] sm:$0xff] }
 0x266   : > { %v1062_v38 = vpop.f32.mrf.mxu2 }
 0x267   : > { %v1063_v51 = vadd.f32 %v2632_v45, %v1062_v38  ;;  %v1030_v38 = vadd.f32 %v2632_v45, %v1029_v7  ;;  %v2365_v7 = vld [vmem:[%s3065_s21 + $0x138] sm:$0xff] }
 0x269   : > { %v1086_v56 = vmax.f32 %v1063_v51, 0.0  ;;  %v2368_v51 = vld [vmem:[%s3065_s21 + $0x150] sm:$0xff] }
 0x26e   : > { %v1065_v39 = vpop.f32.mrf.mxu2 }
 0x26f   : > { %v1066_v49 = vadd.f32 %v2632_v45, %v1065_v39  ;;  %v1027_v39 = vadd.f32 %v2632_v45, %v1026_v6 }
 0x271   : > { %v1087_v54 = vmax.f32 %v1066_v49, 0.0  ;;  %v1074_v11 = vmax.f32 %v1027_v39, 0.0 }
 0x276   : > { %v1068_v44 = vpop.f32.mrf.mxu2 }
 0x277   : > { %v1069_v47 = vadd.f32 %v2632_v45, %v1068_v44  ;;  %v1075_v44 = vmax.f32 %v1030_v38, 0.0  ;;  %v2372_v38 = vld [vmem:[%s3065_s21 + $0x170] sm:$0xff] }
 0x279   : > { %v1088_v52 = vmax.f32 %v1069_v47, 0.0  ;;  %v2367_v47 = vld [vmem:[%s3065_s21 + $0x148] sm:$0xff] }
 0x27e   : > { %v1071_v46 = vpop.f32.mrf.mxu2 }
 0x27f   : > { %v1072_v48 = vadd.f32 %v2632_v45, %v1071_v46 }
 0x281   : > { %v1089_v50 = vmax.f32 %v1072_v48, 0.0 }
 0x283   : > { %1107 = vmatpush.msra.mxu3 %v1089_v50  ;;  %v2324_v50 = vld [vmem:[%s3692_s5 + $0x78] sm:$0xff] }
 0x284   : > { %1363 = vmatpush.msrb.mxu2 %v2324_v50  ;;  %2095 = vmatpush.msra.mxu0 %v2324_v50 }
 0x285   : > { %1108 = vmatpush.msra.mxu3 %v1088_v52 }
 0x286   : > { %1364 = vmatpush.msrb.mxu2 %v2323_v55  ;;  %2096 = vmatpush.msra.mxu0 %v2323_v55 }
 0x287   : > { %1109 = vmatpush.msra.mxu3 %v1087_v54  ;;  %v2369_v54 = vld [vmem:[%s3065_s21 + $0x158] sm:$0xff] }
 0x289   : > { %1110 = vmatpush.msra.mxu3 %v1086_v56 }
 0x28b   : > { %1111 = vmatpush.msra.mxu3 %v1085_v58  ;;  %v2322_v58 = vld [vmem:[%s3692_s5 + $0x68] sm:$0xff] }
 0x28c   : > { %1365 = vmatpush.msrb.mxu2 %v2322_v58  ;;  %2097 = vmatpush.msra.mxu0 %v2322_v58 }
 0x28d   : > { %1112 = vmatpush.msra.mxu3 %v1084_v61  ;;  %v2320_v61 = vld [vmem:[%s3692_s5 + $0x58] sm:$0xff] }
 0x28e   : > { %1366 = vmatpush.msrb.mxu2 %v2321_v59  ;;  %2098 = vmatpush.msra.mxu0 %v2321_v59 }
 0x28f   : > { %1113 = vmatpush.msra.mxu3 %v1083_v63  ;;  %v2319_v63 = vld [vmem:[%s3692_s5 + $0x50] sm:$0xff] }
 0x290   : > { %1367 = vmatpush.msrb.mxu2 %v2320_v61  ;;  %2099 = vmatpush.msra.mxu0 %v2320_v61  ;;  %v3342_v61 = vld [vmem:[%s2972_s20 + $0x58] sm:$0xff]  }
 0x291   : > { %1114 = vmatpush.msra.mxu3 %v1082_v1 }
 0x292   : > { %1368 = vmatpush.msrb.mxu2 %v2319_v63  ;;  %2100 = vmatpush.msra.mxu0 %v2319_v63 }
 0x293   : > { %1115 = vmatpush.msra.mxu3 %v1081_v3  ;;  %v2317_v3 = vld [vmem:[%s3692_s5 + $0x40] sm:$0xff] }
 0x294   : > { %1369 = vmatpush.msrb.mxu2 %v2318_v2  ;;  %2101 = vmatpush.msra.mxu0 %v2318_v2  ;;  %v2558_v2 = vunpack.c.h.bf16 %v3342_v61 }
 0x295   : > { %1116 = vmatpush.msra.mxu3 %v1080_v5 }
 0x296   : > { %1370 = vmatpush.msrb.mxu2 %v2317_v3  ;;  %2102 = vmatpush.msra.mxu0 %v2317_v3 }
 0x297   : > { %1117 = vmatpush.msra.mxu3 %v1079_v16  ;;  %v1456_v16 = vld [vmem:[%s2950_s12 + $0xf8] sm:$0xff] }
 0x299   : > { %1118 = vmatpush.msra.mxu3 %v1078_v15  ;;  %v1454_v15 = vld [vmem:[%s2950_s12 + $0xe8] sm:$0xff] }
 0x29b   : > { %1119 = vmatpush.msra.mxu3 %v1077_v13  ;;  %v1453_v13 = vld [vmem:[%s2950_s12 + $0xe0] sm:$0xff] }
 0x29d   : > { %1120 = vmatpush.msra.mxu3 %v1076_v12 }
 0x29f   : > { %1121 = vmatpush.msra.mxu3 %v1075_v44  ;;  %v1452_v44 = vld [vmem:[%s2950_s12 + $0xd8] sm:$0xff] }
 0x2a1   : > { %1122 = vmatpush.msra.mxu3 %v1074_v11  ;;  %v1451_v11 = vld [vmem:[%s2950_s12 + $0xd0] sm:$0xff] }
 0x2a2   : > { %1123 = vmatmul.f32.vlgmr.msra.gmra.mxu3 %v2513_v17  ;;  %v3196_v17 = vld [vmem:[%s3690_s3 + $0x30] sm:$0xff] }
 0x2a3   : > { %1236 = vmatpush.msrb.mxu1 %v3196_v17  ;;  %1506 = vmatpush.msrb.mxu3 %v1456_v16 }
 0x2a5   : > { %1507 = vmatpush.msrb.mxu3 %v1455_v35 }
 0x2a7   : > { %1508 = vmatpush.msrb.mxu3 %v1454_v15 }
 0x2a9   : > { %1509 = vmatpush.msrb.mxu3 %v1453_v13 }
 0x2aa   : > { %1126 = vmatmul.f32.gmra.mxu3 %v2514_v18  ;;  %v3204_v18 = vld [vmem:[%s3690_s3 + $0x28] sm:$0xff] }
 0x2ab   : > { %1237 = vmatpush.msrb.mxu1 %v3204_v18  ;;  %1510 = vmatpush.msrb.mxu3 %v1452_v44 }
 0x2ad   : > { %1238 = vmatpush.msrb.mxu1 %v3210_v19  ;;  %1511 = vmatpush.msrb.mxu3 %v1451_v11  ;;  %v3368_v11 = vld [vmem:[%s2972_s20 + $0x68] sm:$0xff]  }
 0x2b2   : > { %1129 = vmatmul.f32.gmra.mxu3 %v2517_v20  ;;  %v2358_v20 = vld [vmem:[%s3065_s21 + $0x100] sm:$0xff] }
 0x2ba   : > { %1132 = vmatmul.f32.gmra.mxu3 %v2518_v21 }
 0x2c2   : > { %1135 = vmatmul.f32.gmra.mxu3 %v2521_v23  ;;  %v2359_v23 = vld [vmem:[%s3065_s21 + $0x108] sm:$0xff] }
 0x2ca   : > { %1138 = vmatmul.f32.gmra.mxu3 %v2522_v24 }
 0x2d2   : > { %1141 = vmatmul.f32.gmra.mxu3 %v2525_v26  ;;  %v2360_v26 = vld [vmem:[%s3065_s21 + $0x110] sm:$0xff] }
 0x2da   : > { %1144 = vmatmul.f32.gmra.mxu3 %v2526_v27 }
 0x2e2   : > { %1147 = vmatmul.f32.gmra.mxu3 %v2529_v29  ;;  %v2361_v29 = vld [vmem:[%s3065_s21 + $0x118] sm:$0xff] }
 0x2ea   : > { %1150 = vmatmul.f32.gmra.mxu3 %v2530_v30 }
 0x2f2   : > { %1153 = vmatmul.f32.gmra.mxu3 %v2533_v32  ;;  %v2362_v32 = vld [vmem:[%s3065_s21 + $0x120] sm:$0xff] }
 0x2fa   : > { %1156 = vmatmul.f32.gmra.mxu3 %v2534_v33 }
 0x302   : > { %1159 = vmatmul.f32.gmra.mxu3 %v2537_v37  ;;  %v2363_v37 = vld [vmem:[%s3065_s21 + $0x128] sm:$0xff] }
 0x30a   : > { %1162 = vmatmul.f32.gmra.mxu3 %v2538_v40 }
 0x312   : > { %1165 = vmatmul.f32.gmra.mxu3 %v2541_v42  ;;  %v2364_v42 = vld [vmem:[%s3065_s21 + $0x130] sm:$0xff] }
 0x31a   : > { %1168 = vmatmul.f32.gmra.mxu3 %v2542_v43 }
 0x325   : > { %v1124_v21 = vpop.f32.mrf.mxu3 }
 0x326   : > { %v1125_v22 = vadd.f32 %v2358_v20, %v1124_v21  ;;  %v1450_v20 = vld [vmem:[%s2950_s12 + $0xc8] sm:$0xff]  ;;  %v2373_v21 = vld [vmem:[%s3065_s21 + $0x178] sm:$0xff] }
 0x327   : > { %1512 = vmatpush.msrb.mxu3 %v1450_v20  ;;  %v2565_v20 = vunpack.c.l.bf16 %v3368_v11 }
 0x328   : > { %2374 = vmatmul.msk.f32.vlgmr.msrb.gmra.mxu1 %vm827_vm0, %v1125_v22  ;;  %v1449_v22 = vld [vmem:[%s2950_s12 + $0xc0] sm:$0xff] }
 0x329   : > { %1513 = vmatpush.msrb.mxu3 %v1449_v22 }
 0x32d   : > { %v1127_v24 = vpop.f32.mrf.mxu3 }
 0x32e   : > { %v1128_v25 = vadd.f32 %v2359_v23, %v1127_v24 }
 0x330   : > { %2375 = vmatmul.msk.f32.gmra.mxu1 %vm827_vm0, %v1128_v25  ;;  %v1448_v25 = vld [vmem:[%s2950_s12 + $0xb8] sm:$0xff] }
 0x331   : > { %1514 = vmatpush.msrb.mxu3 %v1448_v25 }
 0x335   : > { %v1130_v27 = vpop.f32.mrf.mxu3 }
 0x336   : > { %v1131_v28 = vadd.f32 %v2360_v26, %v1130_v27  ;;  %v1447_v26 = vld [vmem:[%s2950_s12 + $0xb0] sm:$0xff]  ;;  %v3288_v27 = vld [vmem:[%s3691_s4 + $0x1] ss:$0 sm:$0xff] }
 0x337   : > { %1515 = vmatpush.msrb.mxu3 %v1447_v26 }
 0x338   : > { %2376 = vmatmul.msk.f32.gmra.mxu1 %vm827_vm0, %v1131_v28  ;;  %v1446_v28 = vld [vmem:[%s2950_s12 + $0xa8] sm:$0xff] }
 0x339   : > { %1516 = vmatpush.msrb.mxu3 %v1446_v28 }
 0x33d   : > { %v1133_v30 = vpop.f32.mrf.mxu3 }
 0x33e   : > { %v1134_v31 = vadd.f32 %v2361_v29, %v1133_v30  ;;  %v1445_v29 = vld [vmem:[%s2950_s12 + $0xa0] sm:$0xff] }
 0x33f   : > { %1517 = vmatpush.msrb.mxu3 %v1445_v29  ;;  %v3381_v29 = vld [vmem:[%s2972_s20 + $0x70] sm:$0xff]  }
 0x340   : > { %2377 = vmatmul.msk.f32.gmra.mxu1 %vm827_vm0, %v1134_v31 }
 0x345   : > { %v1136_v33 = vpop.f32.mrf.mxu3 }
 0x346   : > { %v1137_v36 = vadd.f32 %v2362_v32, %v1136_v33  ;;  %v1444_v32 = vld [vmem:[%s2950_s12 + $0x98] sm:$0xff] }
 0x347   : > { %1518 = vmatpush.msrb.mxu3 %v1444_v32 }
 0x348   : > { %2378 = vmatmul.msk.f32.gmra.mxu1 %vm827_vm0, %v1137_v36  ;;  %v1443_v36 = vld [vmem:[%s2950_s12 + $0x90] sm:$0xff] }
 0x349   : > { %1519 = vmatpush.msrb.mxu3 %v1443_v36  ;;  %v2570_v36 = vunpack.c.h.bf16 %v3381_v29 }
 0x34d   : > { %v1139_v40 = vpop.f32.mrf.mxu3 }
 0x34e   : > { %v1140_v41 = vadd.f32 %v2363_v37, %v1139_v40  ;;  %v1442_v37 = vld [vmem:[%s2950_s12 + $0x88] sm:$0xff]  ;;  %v3298_v40 = vld [vmem:[%s2972_s20 + $0x40] sm:$0xff]  }
 0x34f   : > { %1520 = vmatpush.msrb.mxu3 %v1442_v37 }
 0x350   : > { %2379 = vmatmul.msk.f32.gmra.mxu1 %vm827_vm0, %v1140_v41  ;;  %v1441_v41 = vld [vmem:[%s2950_s12 + $0x80] sm:$0xff] }
 0x351   : > { %1521 = vmatpush.msrb.mxu3 %v1441_v41 }
 0x353   : > { %1970 = vmatpush.msra.mxu3 %v3186_v14  ;;  %v3316_v14 = vld [vmem:[%s2972_s20 + $0x48] sm:$0xff]  }
 0x355   : > { %v1142_v43 = vpop.f32.mrf.mxu3  ;;  %1971 = vmatpush.msra.mxu3 %v3196_v17  ;;  %v2549_v17 = vunpack.c.l.bf16 %v3316_v14 }
 0x356   : > { %v1143_v6 = vadd.f32 %v2364_v42, %v1142_v43  ;;  %v2545_v42 = vunpack.c.l.bf16 %v3298_v40 }
 0x357   : > { %1972 = vmatpush.msra.mxu3 %v3204_v18 }
 0x358   : > { %2380 = vmatmul.msk.f32.gmra.mxu1 %vm827_vm0, %v1143_v6  ;;  %1522 = vmatmul.f32.vlgmr.msrb.gmra.mxu3 %v2545_v42 }
 0x359   : > { %1973 = vmatpush.msra.mxu3 %v3210_v19 }
 0x35d   : > { %v1145_v8 = vpop.f32.mrf.mxu3 }
 0x35e   : > { %v1146_v9 = vadd.f32 %v2365_v7, %v1145_v8  ;;  %v2546_v8 = vunpack.c.h.bf16 %v3298_v40  ;;  %v2454_v40 = vld [vmem:[%s3065_s21 + $0x180] sm:$0xff] }
 0x360   : > { %2381 = vmatmul.msk.f32.gmra.mxu1 %vm827_vm0, %v1146_v9  ;;  %1525 = vmatmul.f32.gmra.mxu3 %v2546_v8 }
 0x365   : > { %v1148_v45 = vpop.f32.mrf.mxu3 }
 0x366   : > { %v1149_v46 = vadd.f32 %v2366_v10, %v1148_v45 }
 0x368   : > { %2382 = vmatmul.msk.f32.gmra.mxu1 %vm827_vm0, %v1149_v46  ;;  %1528 = vmatmul.f32.gmra.mxu3 %v2549_v17 }
 0x36d   : > { %v1151_v48 = vpop.f32.mrf.mxu3 }
 0x36e   : > { %v1152_v49 = vadd.f32 %v2367_v47, %v1151_v48  ;;  %v2550_v47 = vunpack.c.h.bf16 %v3316_v14  ;;  %v2455_v14 = vld [vmem:[%s3065_s21 + $0x188] sm:$0xff] }
 0x370   : > { %2383 = vmatmul.msk.f32.gmra.mxu1 %vm827_vm0, %v1152_v49  ;;  %1531 = vmatmul.f32.gmra.mxu3 %v2550_v47 }
 0x375   : > { %v1154_v52 = vpop.f32.mrf.mxu3 }
 0x376   : > { %v1155_v53 = vadd.f32 %v2368_v51, %v1154_v52  ;;  %v3329_v51 = vld [vmem:[%s2972_s20 + $0x50] sm:$0xff]  }
 0x377   : > { %v2553_v52 = vunpack.c.l.bf16 %v3329_v51 }
 0x378   : > { %2384 = vmatmul.msk.f32.gmra.mxu1 %vm827_vm0, %v1155_v53 }
 0x379   : > { %1534 = vmatmul.f32.gmra.mxu3 %v2553_v52 }
 0x37d   : > { %v1157_v56 = vpop.f32.mrf.mxu3 }
 0x37e   : > { %v1158_v57 = vadd.f32 %v2369_v54, %v1157_v56  ;;  %v2554_v56 = vunpack.c.h.bf16 %v3329_v51  ;;  %v2456_v51 = vld [vmem:[%s3065_s21 + $0x190] sm:$0xff] }
 0x380   : > { %2385 = vmatmul.msk.f32.gmra.mxu1 %vm827_vm0, %v1158_v57 }
 0x381   : > { %1537 = vmatmul.f32.gmra.mxu3 %v2554_v56 }
 0x385   : > { %v1160_v0 = vpop.f32.mrf.mxu3 }
 0x386   : > { %v1161_v1 = vadd.f32 %v2370_v62, %v1160_v0  ;;  %v2557_v62 = vunpack.c.l.bf16 %v3342_v61  ;;  %v2457_v61 = vld [vmem:[%s3065_s21 + $0x198] sm:$0xff] }
 0x388   : > { %2386 = vmatmul.msk.f32.gmra.mxu1 %vm827_vm0, %v1161_v1 }
 0x389   : > { %1540 = vmatmul.f32.gmra.mxu3 %v2557_v62 }
 0x38d   : > { %v1163_v5 = vpop.f32.mrf.mxu3 }
 0x38e   : > { %v1164_v34 = vadd.f32 %v2371_v4, %v1163_v5 }
 0x390   : > { %2387 = vmatmul.msk.f32.gmra.mxu1 %vm827_vm0, %v1164_v34  ;;  %v3355_v34 = vld [vmem:[%s2972_s20 + $0x60] sm:$0xff]  }
 0x391   : > { %1543 = vmatmul.f32.gmra.mxu3 %v2558_v2  ;;  %v2561_v16 = vunpack.c.l.bf16 %v3355_v34  ;;  %v2562_v13 = vunpack.c.h.bf16 %v3355_v34  ;;  %v2458_v34 = vld [vmem:[%s3065_s21 + $0x1a0] sm:$0xff] }
 0x395   : > { %v1166_v39 = vpop.f32.mrf.mxu3 }
 0x396   : > { %v1167_v12 = vadd.f32 %v2372_v38, %v1166_v39 }
 0x398   : > { %2388 = vmatmul.msk.f32.gmra.mxu1 %vm827_vm0, %v1167_v12 }
 0x399   : > { %1546 = vmatmul.f32.gmra.mxu3 %v2561_v16 }
 0x39d   : > { %v1169_v23 = vpop.f32.mrf.mxu3 }
 0x39e   : > { %v1170_v24 = vadd.f32 %v2373_v21, %v1169_v23 }
 0x3a0   : > { %2389 = vmatmul.msk.f32.gmra.mxu1 %vm827_vm0, %v1170_v24  ;;  %v2566_v24 = vunpack.c.h.bf16 %v3368_v11  ;;  %v2459_v11 = vld [vmem:[%s3065_s21 + $0x1a8] sm:$0xff] }
 0x3a1   : > { %1549 = vmatmul.f32.gmra.mxu3 %v2562_v13 }
 0x3a5   : > { %v1240_v30 = vpop.f32.mrf.mxu1 }
 0x3a6   : > { %v1241_v31 = vadd.f32 %v3288_v27, %v1240_v30  ;;  %v2569_v30 = vunpack.c.l.bf16 %v3381_v29  ;;  %v2460_v29 = vld [vmem:[%s3065_s21 + $0x1b0] sm:$0xff] }
 0x3a8   : > { %v1288_v33 = vmax.f32 %v1241_v31, 0.0 }
 0x3a9   : > { %1552 = vmatmul.f32.gmra.mxu3 %v2565_v20 }
 0x3aa   : > { %2390 = vmatmul.msk.f32.vlgmr.msrb.gmra.mxu2 %vm960_vm1, %v1288_v33 }
 0x3ad   : > { %v1243_v43 = vpop.f32.mrf.mxu1 }
 0x3ae   : > { %v1244_v6 = vadd.f32 %v3288_v27, %v1243_v43 }
 0x3b0   : > { %v1289_v7 = vmax.f32 %v1244_v6, 0.0  ;;  %v3394_v6 = vld [vmem:[%s2972_s20 + $0x78] sm:$0xff]   ;;  %s2188_s20 = scalar_lea.hbm %s3695_s8, %s2510_s26 }
 0x3b1   : > { %1555 = vmatmul.f32.gmra.mxu3 %v2566_v24  ;;  %s2191_s19 = sshll.u32 %s2188_s20, 4  ;;  %s2192_s19 = int_to_ptr.hbm [resolvable:$true] %s2191_s19 }
 0x3b2   : > { %2391 = vmatmul.msk.f32.gmra.mxu2 %vm960_vm1, %v1289_v7  ;;  %v2573_v7 = vunpack.c.l.bf16 %v3394_v6  ;;  %s2660_s24 = sshra.s32 %s2192_s19, 4  ;;  %s2661_s24 = int_to_ptr.hbm [resolvable:$true] %s2660_s24 }
 0x3b3   : > { %p2667_p4 = scmp.lt.s32.totalorder %s2661_s24, %s3695_s8 }
 0x3b5   : > { %v1246_v9 = vpop.f32.mrf.mxu1 }
 0x3b6   : > { %v1247_v10 = vadd.f32 %v3288_v27, %v1246_v9 }
 0x3b8   : > { %v1290_v45 = vmax.f32 %v1247_v10, 0.0 }
 0x3b9   : > { %1558 = vmatmul.f32.gmra.mxu3 %v2569_v30 }
 0x3ba   : > { %2392 = vmatmul.msk.f32.gmra.mxu2 %vm960_vm1, %v1290_v45 }
 0x3bd   : > { %v1249_v46 = vpop.f32.mrf.mxu1 }
 0x3be   : > { %v1250_v18 = vadd.f32 %v3288_v27, %v1249_v46  ;;  %v2574_v46 = vunpack.c.h.bf16 %v3394_v6  ;;  %v2461_v6 = vld [vmem:[%s3065_s21 + $0x1b8] sm:$0xff] }
 0x3c0   : > { %v1291_v19 = vmax.f32 %v1250_v18, 0.0 }
 0x3c1   : > { %1561 = vmatmul.f32.gmra.mxu3 %v2570_v36 }
 0x3c2   : > { %2393 = vmatmul.msk.f32.gmra.mxu2 %vm960_vm1, %v1291_v19  ;;  %v1490_v19 = vld [vmem:[%s3065_s21 + $0x80] sm:$0xff] }
 0x3c5   : > { %v1252_v48 = vpop.f32.mrf.mxu1 }
 0x3c6   : > { %v1253_v49 = vadd.f32 %v3288_v27, %v1252_v48 }
 0x3c8   : > { %v1292_v50 = vmax.f32 %v1253_v49, 0.0 }
 0x3c9   : > { %1564 = vmatmul.f32.gmra.mxu3 %v2573_v7 }
 0x3ca   : > { %2394 = vmatmul.msk.f32.gmra.mxu2 %vm960_vm1, %v1292_v50 }
 0x3cd   : > { %v1255_v53 = vpop.f32.mrf.mxu1 }
 0x3ce   : > { %v1256_v54 = vadd.f32 %v3288_v27, %v1255_v53  ;;  %v1491_v53 = vld [vmem:[%s3065_s21 + $0x88] sm:$0xff] }
 0x3d0   : > { %v1293_v55 = vmax.f32 %v1256_v54, 0.0 }
 0x3d1   : > { %1567 = vmatmul.f32.gmra.mxu3 %v2574_v46 }
 0x3d2   : > { %2395 = vmatmul.msk.f32.gmra.mxu2 %vm960_vm1, %v1293_v55 }
 0x3d5   : > { %v1258_v57 = vpop.f32.mrf.mxu1 }
 0x3d6   : > { %v1259_v58 = vadd.f32 %v3288_v27, %v1258_v57 }
 0x3d8   : > { %v1294_v59 = vmax.f32 %v1259_v58, 0.0  ;;  %v1492_v58 = vld [vmem:[%s3065_s21 + $0x90] sm:$0xff] }
 0x3da   : > { %2396 = vmatmul.msk.f32.gmra.mxu2 %vm960_vm1, %v1294_v59 }
 0x3db   : > { %v1523_v48 = vpop.f32.mrf.mxu3 }
 0x3dc   : > { %v1524_v49 = vadd.f32 %v1523_v48, %v1490_v19 }
 0x3dd   : > { %v1261_v63 = vpop.f32.mrf.mxu1 }
 0x3de   : > { %v1262_v0 = vadd.f32 %v3288_v27, %v1261_v63  ;;  %2422 = vmatmul.msk.f32.vlgmr.msrb.gmra.mxu0 %vm827_vm0, %v1524_v49 }
 0x3e0   : > { %v1295_v1 = vmax.f32 %v1262_v0, 0.0 }
 0x3e2   : > { %2397 = vmatmul.msk.f32.gmra.mxu2 %vm960_vm1, %v1295_v1  ;;  %v1493_v1 = vld [vmem:[%s3065_s21 + $0x98] sm:$0xff] }
 0x3e3   : > { %v1526_v54 = vpop.f32.mrf.mxu3 }
 0x3e4   : > { %v1527_v55 = vadd.f32 %v1526_v54, %v1491_v53  ;;  %v1500_v53 = vld [vmem:[%s3065_s21 + $0xd0] sm:$0xff] }
 0x3e5   : > { %v1264_v3 = vpop.f32.mrf.mxu1 }
 0x3e6   : > { %v1265_v4 = vadd.f32 %v3288_v27, %v1264_v3  ;;  %2423 = vmatmul.msk.f32.gmra.mxu0 %vm827_vm0, %v1527_v55 }
 0x3e8   : > { %v1296_v5 = vmax.f32 %v1265_v4, 0.0 }
 0x3ea   : > { %2398 = vmatmul.msk.f32.gmra.mxu2 %vm960_vm1, %v1296_v5 }
 0x3eb   : > { %v1529_v59 = vpop.f32.mrf.mxu3 }
 0x3ec   : > { %v1530_v63 = vadd.f32 %v1529_v59, %v1492_v58  ;;  %v1501_v59 = vld [vmem:[%s3065_s21 + $0xd8] sm:$0xff] }
 0x3ed   : > { %v1267_v35 = vpop.f32.mrf.mxu1 }
 0x3ee   : > { %v1268_v15 = vadd.f32 %v3288_v27, %v1267_v35  ;;  %2424 = vmatmul.msk.f32.gmra.mxu0 %vm827_vm0, %v1530_v63  ;;  %v1494_v35 = vld [vmem:[%s3065_s21 + $0xa0] sm:$0xff] }
 0x3f0   : > { %v1297_v38 = vmax.f32 %v1268_v15, 0.0 }
 0x3f2   : > { %2399 = vmatmul.msk.f32.gmra.mxu2 %vm960_vm1, %v1297_v38 }
 0x3f3   : > { %v1532_v3 = vpop.f32.mrf.mxu3 }
 0x3f4   : > { %v1533_v4 = vadd.f32 %v1532_v3, %v1493_v1 }
 0x3f5   : > { %v1270_v39 = vpop.f32.mrf.mxu1 }
 0x3f6   : > { %v1271_v12 = vadd.f32 %v3288_v27, %v1270_v39  ;;  %2425 = vmatmul.msk.f32.gmra.mxu0 %vm827_vm0, %v1533_v4  ;;  %v1502_v4 = vld [vmem:[%s3065_s21 + $0xe0] sm:$0xff] }
 0x3f8   : > { %v1298_v44 = vmax.f32 %v1271_v12, 0.0  ;;  %v1495_v12 = vld [vmem:[%s3065_s21 + $0xa8] sm:$0xff] }
 0x3fa   : > { %2400 = vmatmul.msk.f32.gmra.mxu2 %vm960_vm1, %v1298_v44 }
 0x3fc   : > { %v1535_v15 = vpop.f32.mrf.mxu3 }
 0x3fd   : > { %v1273_v21 = vpop.f32.mrf.mxu1  ;;  %v1536_v38 = vadd.f32 %v1535_v15, %v1494_v35 }
 0x3fe   : > { %v1274_v22 = vadd.f32 %v3288_v27, %v1273_v21 }
 0x3ff   : > { %2426 = vmatmul.msk.f32.gmra.mxu0 %vm827_vm0, %v1536_v38 }
 0x400   : > { %v1299_v23 = vmax.f32 %v1274_v22, 0.0 }
 0x402   : > { %2401 = vmatmul.msk.f32.gmra.mxu2 %vm960_vm1, %v1299_v23  ;;  %v1496_v23 = vld [vmem:[%s3065_s21 + $0xb0] sm:$0xff] }
 0x404   : > { %v1538_v44 = vpop.f32.mrf.mxu3 }
 0x405   : > { %v1276_v25 = vpop.f32.mrf.mxu1  ;;  %v1539_v21 = vadd.f32 %v1538_v44, %v1495_v12  ;;  %v1503_v12 = vld [vmem:[%s3065_s21 + $0xe8] sm:$0xff] }
 0x406   : > { %v1277_v26 = vadd.f32 %v3288_v27, %v1276_v25 }
 0x407   : > { %2427 = vmatmul.msk.f32.gmra.mxu0 %vm827_vm0, %v1539_v21 }
 0x408   : > { %v1300_v28 = vmax.f32 %v1277_v26, 0.0 }
 0x40a   : > { %2402 = vmatmul.msk.f32.gmra.mxu2 %vm960_vm1, %v1300_v28 }
 0x40c   : > { %v1541_v25 = vpop.f32.mrf.mxu3 }
 0x40d   : > { %v1279_v31 = vpop.f32.mrf.mxu1  ;;  %v1542_v26 = vadd.f32 %v1541_v25, %v1496_v23  ;;  %v1504_v25 = vld [vmem:[%s3065_s21 + $0xf0] sm:$0xff] }
 0x40e   : > { %v1280_v32 = vadd.f32 %v3288_v27, %v1279_v31  ;;  %v1497_v31 = vld [vmem:[%s3065_s21 + $0xb8] sm:$0xff] }
 0x40f   : > { %2428 = vmatmul.msk.f32.gmra.mxu0 %vm827_vm0, %v1542_v26 }
 0x410   : > { %v1301_v33 = vmax.f32 %v1280_v32, 0.0 }
 0x412   : > { %2403 = vmatmul.msk.f32.gmra.mxu2 %vm960_vm1, %v1301_v33 }
 0x414   : > { %v1544_v32 = vpop.f32.mrf.mxu3 }
 0x415   : > { %v1282_v37 = vpop.f32.mrf.mxu1  ;;  %v1545_v33 = vadd.f32 %v1544_v32, %v1497_v31  ;;  %v3450_v32 = vld [vmem:[%s3693_s6 + $0x1] ss:$0 sm:$0xff] }
 0x416   : > { %v1283_v41 = vadd.f32 %v3288_v27, %v1282_v37 }
 0x417   : > { %2429 = vmatmul.msk.f32.gmra.mxu0 %vm827_vm0, %v1545_v33 }
 0x418   : > { %v1302_v43 = vmax.f32 %v1283_v41, 0.0  ;;  %v1498_v41 = vld [vmem:[%s3065_s21 + $0xc0] sm:$0xff] }
 0x41a   : > { %2404 = vmatmul.msk.f32.gmra.mxu2 %vm960_vm1, %v1302_v43 }
 0x41c   : > { %v1547_v43 = vpop.f32.mrf.mxu3 }
 0x41d   : > { %v1285_v9 = vpop.f32.mrf.mxu1 }
 0x41e   : > { %v1286_v10 = vadd.f32 %v3288_v27, %v1285_v9  ;;  %v1548_v9 = vadd.f32 %v1547_v43, %v1498_v41  ;;  %v1505_v43 = vld [vmem:[%s3065_s21 + $0xf8] sm:$0xff] }
 0x420   : > { %v1303_v45 = vmax.f32 %v1286_v10, 0.0  ;;  %2430 = vmatmul.msk.f32.gmra.mxu0 %vm827_vm0, %v1548_v9 }
 0x422   : > { %2405 = vmatmul.msk.f32.gmra.mxu2 %vm960_vm1, %v1303_v45  ;;  %v1499_v45 = vld [vmem:[%s3065_s21 + $0xc8] sm:$0xff] }
 0x424   : > { %v1550_v19 = vpop.f32.mrf.mxu3 }
 0x425   : > { %v1551_v48 = vadd.f32 %v1550_v19, %v1499_v45 }
 0x428   : > { %2431 = vmatmul.msk.f32.gmra.mxu0 %vm827_vm0, %v1551_v48 }
 0x42c   : > { %v1553_v54 = vpop.f32.mrf.mxu3 }
 0x42d   : > { %v3404_v18 = vpop.f32.mrf.mxu2  ;;  %v1554_v55 = vadd.f32 %v1553_v54, %v1500_v53 }
 0x430   : > { %2432 = vmatmul.msk.f32.gmra.mxu0 %vm827_vm0, %v1554_v55 }
 0x434   : > { %v1556_v63 = vpop.f32.mrf.mxu3 }
 0x435   : > { %v3408_v50 = vpop.f32.mrf.mxu2  ;;  %v1557_v1 = vadd.f32 %v1556_v63, %v1501_v59 }
 0x438   : > { %2433 = vmatmul.msk.f32.gmra.mxu0 %vm827_vm0, %v1557_v1 }
 0x43c   : > { %v1559_v35 = vpop.f32.mrf.mxu3 }
 0x43d   : > { %v3412_v57 = vpop.f32.mrf.mxu2  ;;  %v1560_v15 = vadd.f32 %v1559_v35, %v1502_v4 }
 0x440   : > { %2434 = vmatmul.msk.f32.gmra.mxu0 %vm827_vm0, %v1560_v15  ;;  %v2638_v15 = vld [vmem:[%s3692_s5 + $0x20] sm:$0xff] }
 0x444   : > { %v1562_v44 = vpop.f32.mrf.mxu3 }
 0x445   : > { %v3416_v0 = vpop.f32.mrf.mxu2  ;;  %v1563_v21 = vadd.f32 %v1562_v44, %v1503_v12  ;;  %v2639_v12 = vld [vmem:[%s3692_s5 + $0x18] sm:$0xff]  ;;  %v2640_v44 = vld [vmem:[%s3692_s5 + $0x10] sm:$0xff] }
 0x448   : > { %2435 = vmatmul.msk.f32.gmra.mxu0 %vm827_vm0, %v1563_v21 }
 0x44c   : > { %v1565_v26 = vpop.f32.mrf.mxu3 }
 0x44d   : > { %v3420_v5 = vpop.f32.mrf.mxu2  ;;  %v1566_v31 = vadd.f32 %v1565_v26, %v1504_v25  ;;  %v2643_v26 = vld [vmem:[%s3691_s4] ss:$0 sm:$0xff] }
 0x44e   : > { %v1385_v35 = vadd.f32 %v3450_v32, %v3420_v5  ;;  %v1420_v5 = vld [vmem:[%s3480_s23] sm:$0xff] }
 0x450   : > { %2436 = vmatmul.msk.f32.gmra.mxu0 %vm827_vm0, %v1566_v31 }
 0x454   : > { %v1568_v45 = vpop.f32.mrf.mxu3 }
 0x455   : > { %v3424_v39 = vpop.f32.mrf.mxu2  ;;  %v1569_v48 = vadd.f32 %v1568_v45, %v1505_v43 }
 0x458   : > { %2437 = vmatmul.msk.f32.gmra.mxu0 %vm827_vm0, %v1569_v48 }
 0x45b   : > { %v1636_v59 = vpop.f32.mrf.mxu0 }
 0x45d   : > { %v3428_v22 = vpop.f32.mrf.mxu2 }
 0x465   : > { %v1393_v28 = vpop.f32.mrf.mxu2 }
 0x466   : > { %v1394_v4 = vadd.f32 %v3450_v32, %v1393_v28  ;;  %v1379_v28 = vadd.f32 %v3450_v32, %v3412_v57  ;;  %v2635_v57 = vld [vmem:[%s3692_s5 + $0x38] sm:$0xff] }
 0x46d   : > { %v1396_v37 = vpop.f32.mrf.mxu2 }
 0x46e   : > { %v1397_v1 = vadd.f32 %v3450_v32, %v1396_v37  ;;  %v1382_v37 = vadd.f32 %v3450_v32, %v3416_v0  ;;  %v1373_v0 = vadd.f32 %v3450_v32, %v3404_v18 }
 0x475   : > { %v1399_v10 = vpop.f32.mrf.mxu2 }
 0x476   : > { %v1400_v63 = vadd.f32 %v3450_v32, %v1399_v10  ;;  %v1376_v10 = vadd.f32 %v3450_v32, %v3408_v50  ;;  %v2636_v50 = vld [vmem:[%s3692_s5 + $0x30] sm:$0xff] }
 0x47d   : > { %v1402_v49 = vpop.f32.mrf.mxu2 }
 0x47e   : > { %v1403_v55 = vadd.f32 %v3450_v32, %v1402_v49  ;;  %v1388_v49 = vadd.f32 %v3450_v32, %v3424_v39  ;;  %v2637_v39 = vld [vmem:[%s3692_s5 + $0x28] sm:$0xff] }
 0x485   : > { %v1405_v58 = vpop.f32.mrf.mxu2 }
 0x486   : > { %v1406_v54 = vadd.f32 %v3450_v32, %v1405_v58  ;;  %v1639_v58 = vpop.f32.mrf.mxu0 }
 0x487   : > { %v1640_v31 = vadd.f32 %v2643_v26, %v1639_v58 }
 0x48d   : > { %v1408_v3 = vpop.f32.mrf.mxu2 }
 0x48e   : > { %v1409_v53 = vadd.f32 %v3450_v32, %v1408_v3  ;;  %v1391_v3 = vadd.f32 %v3450_v32, %v3428_v22  ;;  %v1642_v22 = vpop.f32.mrf.mxu0 }
 0x495   : > { %v1411_v38 = vpop.f32.mrf.mxu2 }
 0x496   : > { %v1412_v19 = vadd.f32 %v3450_v32, %v1411_v38  ;;  %v1645_v18 = vpop.f32.mrf.mxu0  ;;  %v1637_v38 = vadd.f32 %v3126_v60, %v1636_v59  ;;  %v2642_v60 = vld [vmem:[%s3692_s5] sm:$0xff] }
 0x497   : > { %v1646_v45 = vadd.f32 %v2643_v26, %v1645_v18 }
 0x498   : > { %v1684_v21 = vmax.f32 %v1637_v38, 0.0 }
 0x499   : > { %v1687_v48 = vmax.f32 %v1646_v45, 0.0 }
 0x49d   : > { %v1414_v23 = vpop.f32.mrf.mxu2 }
 0x49e   : > { %v1415_v9 = vadd.f32 %v3450_v32, %v1414_v23  ;;  %v2641_v23 = vld [vmem:[%s3692_s5 + $0x8] sm:$0xff]  ;;  %v1648_v25 = vpop.f32.mrf.mxu0 }
 0x4a5   : > { %v1417_v33 = vpop.f32.mrf.mxu2 }
 0x4a6   : > { %v1418_v41 = vadd.f32 %v3450_v32, %v1417_v33  ;;  %v1685_v33 = vmax.f32 %v1640_v31, 0.0  ;;  %v1651_v43 = vpop.f32.mrf.mxu0 }
 0x4a7   : > { %v1652_v59 = vadd.f32 %v2643_v26, %v1651_v43 }
 0x4a8   : > { %1421 = vmatpush.msra.mxu1 %v1418_v41  ;;  %v1643_v41 = vadd.f32 %v2643_v26, %v1642_v22 }
 0x4aa   : > { %1422 = vmatpush.msra.mxu1 %v1415_v9  ;;  %v1686_v9 = vmax.f32 %v1643_v41, 0.0 }
 0x4ac   : > { %1423 = vmatpush.msra.mxu1 %v1412_v19 }
 0x4ae   : > { %1424 = vmatpush.msra.mxu1 %v1409_v53  ;;  %v1654_v19 = vpop.f32.mrf.mxu0  ;;  %v1649_v53 = vadd.f32 %v2643_v26, %v1648_v25 }
 0x4b0   : > { %1425 = vmatpush.msra.mxu1 %v1406_v54  ;;  %v1688_v54 = vmax.f32 %v1649_v53, 0.0 }
 0x4b2   : > { %1426 = vmatpush.msra.mxu1 %v1403_v55 }
 0x4b4   : > { %1427 = vmatpush.msra.mxu1 %v1400_v63  ;;  %v1689_v63 = vmax.f32 %v1652_v59, 0.0 }
 0x4b6   : > { %1428 = vmatpush.msra.mxu1 %v1397_v1  ;;  %v1657_v55 = vpop.f32.mrf.mxu0 }
 0x4b7   : > { %v1658_v58 = vadd.f32 %v2643_v26, %v1657_v55 }
 0x4b8   : > { %1429 = vmatpush.msra.mxu1 %v1394_v4  ;;  %v1655_v4 = vadd.f32 %v2643_v26, %v1654_v19 }
 0x4ba   : > { %1430 = vmatpush.msra.mxu1 %v1391_v3  ;;  %v1690_v3 = vmax.f32 %v1655_v4, 0.0 }
 0x4bc   : > { %1431 = vmatpush.msra.mxu1 %v1388_v49 }
 0x4be   : > { %1432 = vmatpush.msra.mxu1 %v1385_v35  ;;  %v1660_v1 = vpop.f32.mrf.mxu0  ;;  %v1691_v35 = vmax.f32 %v1658_v58, 0.0 }
 0x4c0   : > { %1433 = vmatpush.msra.mxu1 %v1382_v37  ;;  %v1661_v37 = vadd.f32 %v2643_v26, %v1660_v1 }
 0x4c2   : > { %1434 = vmatpush.msra.mxu1 %v1379_v28  ;;  %v1692_v22 = vmax.f32 %v1661_v37, 0.0 }
 0x4c4   : > { %1435 = vmatpush.msra.mxu1 %v1376_v10 }
 0x4c6   : > { %1436 = vmatpush.msra.mxu1 %v1373_v0  ;;  %v1663_v49 = vpop.f32.mrf.mxu0 }
 0x4c7   : > { %1437 = vmatmul.f32.vlgmr.msra.gmra.mxu1 %v1420_v5  ;;  %v1664_v10 = vadd.f32 %v2643_v26, %v1663_v49 }
 0x4c8   : > { %1756 = vmatpush.msrb.mxu1 %v2635_v57 }
 0x4c9   : > { %v1693_v0 = vmax.f32 %v1664_v10, 0.0 }
 0x4ca   : > { %1757 = vmatpush.msrb.mxu1 %v2636_v50 }
 0x4cc   : > { %1758 = vmatpush.msrb.mxu1 %v2637_v39 }
 0x4ce   : > { %1759 = vmatpush.msrb.mxu1 %v2638_v15  ;;  %v1666_v28 = vpop.f32.mrf.mxu0 }
 0x4cf   : > { %v1667_v57 = vadd.f32 %v2643_v26, %v1666_v28  ;;  %v2644_v28 = vld [vmem:[%s3693_s6] ss:$0 sm:$0xff] }
 0x4d0   : > { %1760 = vmatpush.msrb.mxu1 %v2639_v12 }
 0x4d1   : > { %v1694_v50 = vmax.f32 %v1667_v57, 0.0 }
 0x4d2   : > { %1761 = vmatpush.msrb.mxu1 %v2640_v44 }
 0x4d4   : > { %1762 = vmatpush.msrb.mxu1 %v2641_v23 }
 0x4d6   : > { %1763 = vmatpush.msrb.mxu1 %v2642_v60  ;;  %v1669_v5 = vpop.f32.mrf.mxu0 }
 0x4d7   : > { %2438 = vmatmul.msk.f32.vlgmr.msrb.gmra.mxu1 %vm960_vm1, %v1684_v21  ;;  %v1670_v18 = vadd.f32 %v2643_v26, %v1669_v5 }
 0x4d9   : > { %v1695_v15 = vmax.f32 %v1670_v18, 0.0 }
 0x4de   : > { %v1672_v39 = vpop.f32.mrf.mxu0 }
 0x4df   : > { %2439 = vmatmul.msk.f32.gmra.mxu1 %vm960_vm1, %v1685_v33  ;;  %v1673_v38 = vadd.f32 %v2643_v26, %v1672_v39 }
 0x4e1   : > { %v1696_v44 = vmax.f32 %v1673_v38, 0.0 }
 0x4e6   : > { %v1675_v12 = vpop.f32.mrf.mxu0 }
 0x4e7   : > { %2440 = vmatmul.msk.f32.gmra.mxu1 %vm960_vm1, %v1686_v9  ;;  %v1676_v21 = vadd.f32 %v2643_v26, %v1675_v12 }
 0x4e9   : > { %v1697_v60 = vmax.f32 %v1676_v21, 0.0 }
 0x4ee   : > { %v1678_v23 = vpop.f32.mrf.mxu0 }
 0x4ef   : > { %2441 = vmatmul.msk.f32.gmra.mxu1 %vm960_vm1, %v1687_v48  ;;  %v1679_v25 = vadd.f32 %v2643_v26, %v1678_v23 }
 0x4f1   : > { %v1698_v31 = vmax.f32 %v1679_v25, 0.0 }
 0x4f6   : > { %v1681_v33 = vpop.f32.mrf.mxu0 }
 0x4f7   : > { %2442 = vmatmul.msk.f32.gmra.mxu1 %vm960_vm1, %v1688_v54  ;;  %v1682_v43 = vadd.f32 %v2643_v26, %v1681_v33 }
 0x4f9   : > { %v1699_v9 = vmax.f32 %v1682_v43, 0.0 }
 0x4ff   : > { %2443 = vmatmul.msk.f32.gmra.mxu1 %vm960_vm1, %v1689_v63 }
 0x507   : > { %2444 = vmatmul.msk.f32.gmra.mxu1 %vm960_vm1, %v1690_v3 }
 0x50f   : > { %2445 = vmatmul.msk.f32.gmra.mxu1 %vm960_vm1, %v1691_v35 }
 0x517   : > { %2446 = vmatmul.msk.f32.gmra.mxu1 %vm960_vm1, %v1692_v22 }
 0x51f   : > { %2447 = vmatmul.msk.f32.gmra.mxu1 %vm960_vm1, %v1693_v0 }
 0x527   : > { %2448 = vmatmul.msk.f32.gmra.mxu1 %vm960_vm1, %v1694_v50 }
 0x52f   : > { %2449 = vmatmul.msk.f32.gmra.mxu1 %vm960_vm1, %v1695_v15 }
 0x537   : > { %2450 = vmatmul.msk.f32.gmra.mxu1 %vm960_vm1, %v1696_v44 }
 0x53f   : > { %2451 = vmatmul.msk.f32.gmra.mxu1 %vm960_vm1, %v1697_v60 }
 0x544   : > { %v1438_v41 = vpop.f32.mrf.mxu1 }
 0x545   : > { %2174 = vst.msk [vmem:[%s3529_s22] sm:$0xff] %vm827_vm0, %v1438_v41 }
 0x547   : > { %2452 = vmatmul.msk.f32.gmra.mxu1 %vm960_vm1, %v1698_v31 }
 0x54f   : > { %2453 = vmatmul.msk.f32.gmra.mxu1 %vm960_vm1, %v1699_v9 }
 0x554   : > { %v1765_v45 = vpop.f32.mrf.mxu1 }
 0x55c   : > { %v1768_v19 = vpop.f32.mrf.mxu1 }
 0x564   : > { %v1771_v48 = vpop.f32.mrf.mxu1 }
 0x56c   : > { %v1774_v53 = vpop.f32.mrf.mxu1 }
 0x574   : > { %v1777_v54 = vpop.f32.mrf.mxu1 }
 0x575   : > { %v1778_v9 = vadd.f32 %v2644_v28, %v1777_v54 }
 0x57c   : > { %v1780_v55 = vpop.f32.mrf.mxu1 }
 0x57d   : > { %v1781_v41 = vadd.f32 %v2644_v28, %v1780_v55 }
 0x584   : > { %v1783_v59 = vpop.f32.mrf.mxu1 }
 0x585   : > { %v1784_v31 = vadd.f32 %v2644_v28, %v1783_v59 }
 0x58c   : > { %v1786_v63 = vpop.f32.mrf.mxu1 }
 0x58d   : > { %v1787_v60 = vadd.f32 %v2644_v28, %v1786_v63  ;;  %v1766_v63 = vadd.f32 %v2644_v28, %v1765_v45  ;;  %v2462_v45 = vld [vmem:[%s3065_s21 + $0x1c0] sm:$0xff] }
 0x58f   : > { %v1820_v43 = vmax.f32 %v1787_v60, 0.0  ;;  %v1813_v55 = vmax.f32 %v1766_v63, 0.0 }
 0x594   : > { %v1789_v1 = vpop.f32.mrf.mxu1 }
 0x595   : > { %v1790_v21 = vadd.f32 %v2644_v28, %v1789_v1  ;;  %v1769_v1 = vadd.f32 %v2644_v28, %v1768_v19 }
 0x597   : > { %v1821_v33 = vmax.f32 %v1790_v21, 0.0  ;;  %v1814_v59 = vmax.f32 %v1769_v1, 0.0  ;;  %v2468_v21 = vld [vmem:[%s3065_s21 + $0x1f0] sm:$0xff] }
 0x59c   : > { %v1792_v4 = vpop.f32.mrf.mxu1 }
 0x59d   : > { %v1793_v12 = vadd.f32 %v2644_v28, %v1792_v4  ;;  %v1772_v4 = vadd.f32 %v2644_v28, %v1771_v48 }
 0x59f   : > { %v1822_v25 = vmax.f32 %v1793_v12, 0.0 }
 0x5a4   : > { %v1795_v3 = vpop.f32.mrf.mxu1 }
 0x5a5   : > { %v1796_v15 = vadd.f32 %v2644_v28, %v1795_v3  ;;  %v1775_v3 = vadd.f32 %v2644_v28, %v1774_v53  ;;  %v2463_v53 = vld [vmem:[%s3065_s21 + $0x1c8] sm:$0xff] }
 0x5a7   : > { %v1823_v23 = vmax.f32 %v1796_v15, 0.0 }
 0x5ac   : > { %v1798_v26 = vpop.f32.mrf.mxu1 }
 0x5ad   : > { %v1799_v39 = vadd.f32 %v2644_v28, %v1798_v26  ;;  %v1819_v26 = vmax.f32 %v1784_v31, 0.0 }
 0x5af   : > { %v1824_v44 = vmax.f32 %v1799_v39, 0.0  ;;  %v2466_v39 = vld [vmem:[%s3065_s21 + $0x1e0] sm:$0xff] }
 0x5b4   : > { %v1801_v58 = vpop.f32.mrf.mxu1 }
 0x5b5   : > { %v1802_v57 = vadd.f32 %v2644_v28, %v1801_v58  ;;  %v1818_v58 = vmax.f32 %v1781_v41, 0.0 }
 0x5b7   : > { %v1825_v38 = vmax.f32 %v1802_v57, 0.0 }
 0x5bc   : > { %v1804_v49 = vpop.f32.mrf.mxu1 }
 0x5bd   : > { %v1805_v0 = vadd.f32 %v2644_v28, %v1804_v49  ;;  %v1817_v49 = vmax.f32 %v1778_v9, 0.0 }
 0x5bf   : > { %v1826_v18 = vmax.f32 %v1805_v0, 0.0 }
 0x5c4   : > { %v1807_v35 = vpop.f32.mrf.mxu1 }
 0x5c5   : > { %v1808_v22 = vadd.f32 %v2644_v28, %v1807_v35  ;;  %v1816_v35 = vmax.f32 %v1775_v3, 0.0 }
 0x5c7   : > { %v1827_v50 = vmax.f32 %v1808_v22, 0.0  ;;  %v2464_v22 = vld [vmem:[%s3065_s21 + $0x1d0] sm:$0xff] }
 0x5cc   : > { %v1810_v37 = vpop.f32.mrf.mxu1 }
 0x5cd   : > { %v1811_v10 = vadd.f32 %v2644_v28, %v1810_v37  ;;  %v1815_v37 = vmax.f32 %v1772_v4, 0.0 }
 0x5cf   : > { %v1828_v5 = vmax.f32 %v1811_v10, 0.0 }
 0x5d1   : > { %1845 = vmatpush.msra.mxu2 %v1828_v5  ;;  %v2465_v5 = vld [vmem:[%s3065_s21 + $0x1d8] sm:$0xff] }
 0x5d3   : > { %1846 = vmatpush.msra.mxu2 %v1827_v50 }
 0x5d5   : > { %1847 = vmatpush.msra.mxu2 %v1826_v18 }
 0x5d7   : > { %1848 = vmatpush.msra.mxu2 %v1825_v38  ;;  %v2467_v38 = vld [vmem:[%s3065_s21 + $0x1e8] sm:$0xff] }
 0x5d9   : > { %1849 = vmatpush.msra.mxu2 %v1824_v44 }
 0x5db   : > { %1850 = vmatpush.msra.mxu2 %v1823_v23 }
 0x5dd   : > { %1851 = vmatpush.msra.mxu2 %v1822_v25  ;;  %v2469_v25 = vld [vmem:[%s3065_s21 + $0x1f8] sm:$0xff]  ;;  %s2662_s21 = scalar_lea.hbm %s2661_s24, 16 }
 0x5de   : > { %p2663_p1 = scmp.ne.s32.totalorder %s2661_s24, %s2662_s21  ;;  %p2668_p5 = scmp.lt.s32.totalorder %s2666_s25, %s2662_s21 }
 0x5df   : > { %1852 = vmatpush.msra.mxu2 %v1821_v33 }
 0x5e0   : > { %p2664_p2 = pnand %p2663_p1, %p2796_p6  ;;  %p2669_p7 = por %p2668_p5, %p2667_p4 }
 0x5e1   : > { %1853 = vmatpush.msra.mxu2 %v1820_v43 }
 0x5e2   : > { %p2665_p3 = pneg %p2664_p2 }
 0x5e3   : > { %1854 = vmatpush.msra.mxu2 %v1819_v26 }
 0x5e4   : > { %p2670_p10 = pnand %p2669_p7, %p2665_p3 }
 0x5e5   : > { %1855 = vmatpush.msra.mxu2 %v1818_v58 }
 0x5e7   : > { %1856 = vmatpush.msra.mxu2 %v1817_v49 }
 0x5e9   : > { %1857 = vmatpush.msra.mxu2 %v1816_v35 }
 0x5eb   : > { %1858 = vmatpush.msra.mxu2 %v1815_v37 }
 0x5ed   : > { %1859 = vmatpush.msra.mxu2 %v1814_v59 }
 0x5ef   : > { %1860 = vmatpush.msra.mxu2 %v1813_v55 }
 0x5f0   : > { %1861 = vmatmul.f32.vlgmr.msra.gmra.mxu2 %v2545_v42 }
 0x5f8   : > { %1864 = vmatmul.f32.gmra.mxu2 %v2546_v8 }
 0x600   : > { %1867 = vmatmul.f32.gmra.mxu2 %v2549_v17 }
 0x608   : > { %1870 = vmatmul.f32.gmra.mxu2 %v2550_v47 }
 0x610   : > { %1873 = vmatmul.f32.gmra.mxu2 %v2553_v52 }
 0x618   : > { %1876 = vmatmul.f32.gmra.mxu2 %v2554_v56 }
 0x620   : > { %1879 = vmatmul.f32.gmra.mxu2 %v2557_v62 }
 0x628   : > { %1882 = vmatmul.f32.gmra.mxu2 %v2558_v2 }
 0x630   : > { %1885 = vmatmul.f32.gmra.mxu2 %v2561_v16 }
 0x638   : > { %1888 = vmatmul.f32.gmra.mxu2 %v2562_v13 }
 0x640   : > { %1891 = vmatmul.f32.gmra.mxu2 %v2565_v20 }
 0x648   : > { %1894 = vmatmul.f32.gmra.mxu2 %v2566_v24 }
 0x650   : > { %1897 = vmatmul.f32.gmra.mxu2 %v2569_v30 }
 0x658   : > { %1900 = vmatmul.f32.gmra.mxu2 %v2570_v36 }
 0x660   : > { %1903 = vmatmul.f32.gmra.mxu2 %v2573_v7 }
 0x668   : > { %1906 = vmatmul.f32.gmra.mxu2 %v2574_v46 }
 0x673   : > { %v1862_v42 = vpop.f32.mrf.mxu2 }
 0x674   : > { %v1863_v8 = vadd.f32 %v2454_v40, %v1862_v42 }
 0x676   : > { %2470 = vmatmul.msk.f32.vlgmr.msra.gmra.mxu3 %vm827_vm0, %v1863_v8 }
 0x67b   : > { %v1865_v17 = vpop.f32.mrf.mxu2 }
 0x67c   : > { %v1866_v47 = vadd.f32 %v2455_v14, %v1865_v17 }
 0x67e   : > { %2471 = vmatmul.msk.f32.gmra.mxu3 %vm827_vm0, %v1866_v47 }
 0x683   : > { %v1868_v52 = vpop.f32.mrf.mxu2 }
 0x684   : > { %v1869_v56 = vadd.f32 %v2456_v51, %v1868_v52 }
 0x686   : > { %2472 = vmatmul.msk.f32.gmra.mxu3 %vm827_vm0, %v1869_v56 }
 0x68b   : > { %v1871_v62 = vpop.f32.mrf.mxu2 }
 0x68c   : > { %v1872_v2 = vadd.f32 %v2457_v61, %v1871_v62 }
 0x68e   : > { %2473 = vmatmul.msk.f32.gmra.mxu3 %vm827_vm0, %v1872_v2 }
 0x693   : > { %v1874_v16 = vpop.f32.mrf.mxu2 }
 0x694   : > { %v1875_v13 = vadd.f32 %v2458_v34, %v1874_v16 }
 0x696   : > { %2474 = vmatmul.msk.f32.gmra.mxu3 %vm827_vm0, %v1875_v13 }
 0x69b   : > { %v1877_v20 = vpop.f32.mrf.mxu2 }
 0x69c   : > { %v1878_v24 = vadd.f32 %v2459_v11, %v1877_v20 }
 0x69e   : > { %2475 = vmatmul.msk.f32.gmra.mxu3 %vm827_vm0, %v1878_v24 }
 0x6a3   : > { %v1880_v30 = vpop.f32.mrf.mxu2 }
 0x6a4   : > { %v1881_v36 = vadd.f32 %v2460_v29, %v1880_v30 }
 0x6a6   : > { %2476 = vmatmul.msk.f32.gmra.mxu3 %vm827_vm0, %v1881_v36 }
 0x6ab   : > { %v1883_v7 = vpop.f32.mrf.mxu2 }
 0x6ac   : > { %v1884_v46 = vadd.f32 %v2461_v6, %v1883_v7 }
 0x6ae   : > { %2477 = vmatmul.msk.f32.gmra.mxu3 %vm827_vm0, %v1884_v46 }
 0x6b3   : > { %v1886_v19 = vpop.f32.mrf.mxu2 }
 0x6b4   : > { %v1887_v48 = vadd.f32 %v2462_v45, %v1886_v19 }
 0x6b6   : > { %2478 = vmatmul.msk.f32.gmra.mxu3 %vm827_vm0, %v1887_v48 }
 0x6bb   : > { %v1889_v54 = vpop.f32.mrf.mxu2 }
 0x6bc   : > { %v1890_v28 = vadd.f32 %v2463_v53, %v1889_v54 }
 0x6be   : > { %2479 = vmatmul.msk.f32.gmra.mxu3 %vm827_vm0, %v1890_v28  ;;  %v2645_v28 = vld [vmem:[%s3691_s4 + $0x1] ss:$0 sm:$0xff] }
 0x6c3   : > { %v1892_v10 = vpop.f32.mrf.mxu2 }
 0x6c4   : > { %v1893_v0 = vadd.f32 %v2464_v22, %v1892_v10 }
 0x6c6   : > { %2480 = vmatmul.msk.f32.gmra.mxu3 %vm827_vm0, %v1893_v0 }
 0x6cb   : > { %v1895_v57 = vpop.f32.mrf.mxu2 }
 0x6cc   : > { %v1896_v50 = vadd.f32 %v2465_v5, %v1895_v57 }
 0x6ce   : > { %2481 = vmatmul.msk.f32.gmra.mxu3 %vm827_vm0, %v1896_v50 }
 0x6d3   : > { %v1898_v18 = vpop.f32.mrf.mxu2 }
 0x6d4   : > { %v1899_v15 = vadd.f32 %v2466_v39, %v1898_v18 }
 0x6d6   : > { %2482 = vmatmul.msk.f32.gmra.mxu3 %vm827_vm0, %v1899_v15 }
 0x6db   : > { %v1901_v12 = vpop.f32.mrf.mxu2 }
 0x6dc   : > { %v1902_v44 = vadd.f32 %v2467_v38, %v1901_v12 }
 0x6de   : > { %2483 = vmatmul.msk.f32.gmra.mxu3 %vm827_vm0, %v1902_v44 }
 0x6e3   : > { %v1904_v23 = vpop.f32.mrf.mxu2 }
 0x6e4   : > { %v1905_v60 = vadd.f32 %v2468_v21, %v1904_v23 }
 0x6e6   : > { %2484 = vmatmul.msk.f32.gmra.mxu3 %vm827_vm0, %v1905_v60 }
 0x6eb   : > { %v1907_v31 = vpop.f32.mrf.mxu2 }
 0x6ec   : > { %v1908_v33 = vadd.f32 %v2469_v25, %v1907_v31 }
 0x6ee   : > { %2485 = vmatmul.msk.f32.gmra.mxu3 %vm827_vm0, %v1908_v33 }
 0x6f9   : > { %v1975_v41 = vpop.f32.mrf.mxu3 }
 0x6fa   : > { %v1976_v43 = vadd.f32 %v3288_v27, %v1975_v41 }
 0x6fc   : > { %v2023_v9 = vmax.f32 %v1976_v43, 0.0 }
 0x6fe   : > { %2486 = vmatmul.msk.f32.vlgmr.msra.gmra.mxu0 %vm960_vm1, %v2023_v9 }
 0x701   : > { %v1978_v26 = vpop.f32.mrf.mxu3 }
 0x702   : > { %v1979_v3 = vadd.f32 %v3288_v27, %v1978_v26 }
 0x704   : > { %v2024_v58 = vmax.f32 %v1979_v3, 0.0 }
 0x706   : > { %2487 = vmatmul.msk.f32.gmra.mxu0 %vm960_vm1, %v2024_v58 }
 0x709   : > { %v1981_v4 = vpop.f32.mrf.mxu3 }
 0x70a   : > { %v1982_v49 = vadd.f32 %v3288_v27, %v1981_v4 }
 0x70c   : > { %v2025_v1 = vmax.f32 %v1982_v49, 0.0 }
 0x70e   : > { %2488 = vmatmul.msk.f32.gmra.mxu0 %vm960_vm1, %v2025_v1 }
 0x711   : > { %v1984_v35 = vpop.f32.mrf.mxu3 }
 0x712   : > { %v1985_v63 = vadd.f32 %v3288_v27, %v1984_v35 }
 0x714   : > { %v2026_v37 = vmax.f32 %v1985_v63, 0.0 }
 0x716   : > { %2489 = vmatmul.msk.f32.gmra.mxu0 %vm960_vm1, %v2026_v37 }
 0x719   : > { %v1987_v59 = vpop.f32.mrf.mxu3 }
 0x71a   : > { %v1988_v55 = vadd.f32 %v3288_v27, %v1987_v59 }
 0x71c   : > { %v2027_v40 = vmax.f32 %v1988_v55, 0.0 }
 0x71e   : > { %2490 = vmatmul.msk.f32.gmra.mxu0 %vm960_vm1, %v2027_v40 }
 0x721   : > { %v1990_v42 = vpop.f32.mrf.mxu3 }
 0x722   : > { %v1991_v8 = vadd.f32 %v3288_v27, %v1990_v42 }
 0x724   : > { %v2028_v14 = vmax.f32 %v1991_v8, 0.0 }
 0x726   : > { %2491 = vmatmul.msk.f32.gmra.mxu0 %vm960_vm1, %v2028_v14 }
 0x729   : > { %v1993_v17 = vpop.f32.mrf.mxu3 }
 0x72a   : > { %v1994_v47 = vadd.f32 %v3288_v27, %v1993_v17  ;;  %v2502_v17 = vld [vmem:[%s3480_s23 + $0x8] sm:$0xff] }
 0x72c   : > { %v2029_v51 = vmax.f32 %v1994_v47, 0.0 }
 0x72e   : > { %2492 = vmatmul.msk.f32.gmra.mxu0 %vm960_vm1, %v2029_v51 }
 0x731   : > { %v1996_v52 = vpop.f32.mrf.mxu3 }
 0x732   : > { %v1997_v56 = vadd.f32 %v3288_v27, %v1996_v52 }
 0x734   : > { %v2030_v61 = vmax.f32 %v1997_v56, 0.0 }
 0x736   : > { %2493 = vmatmul.msk.f32.gmra.mxu0 %vm960_vm1, %v2030_v61 }
 0x739   : > { %v1999_v62 = vpop.f32.mrf.mxu3 }
 0x73a   : > { %v2000_v2 = vadd.f32 %v3288_v27, %v1999_v62 }
 0x73c   : > { %v2031_v34 = vmax.f32 %v2000_v2, 0.0 }
 0x73e   : > { %2494 = vmatmul.msk.f32.gmra.mxu0 %vm960_vm1, %v2031_v34 }
 0x741   : > { %v2002_v16 = vpop.f32.mrf.mxu3 }
 0x742   : > { %v2003_v13 = vadd.f32 %v3288_v27, %v2002_v16 }
 0x744   : > { %v2032_v11 = vmax.f32 %v2003_v13, 0.0 }
 0x746   : > { %2495 = vmatmul.msk.f32.gmra.mxu0 %vm960_vm1, %v2032_v11 }
 0x749   : > { %v2005_v20 = vpop.f32.mrf.mxu3 }
 0x74a   : > { %v2006_v24 = vadd.f32 %v3288_v27, %v2005_v20 }
 0x74c   : > { %v2033_v29 = vmax.f32 %v2006_v24, 0.0 }
 0x74e   : > { %2496 = vmatmul.msk.f32.gmra.mxu0 %vm960_vm1, %v2033_v29 }
 0x751   : > { %v2008_v30 = vpop.f32.mrf.mxu3 }
 0x752   : > { %v2009_v36 = vadd.f32 %v3288_v27, %v2008_v30 }
 0x754   : > { %v2034_v6 = vmax.f32 %v2009_v36, 0.0 }
 0x756   : > { %2497 = vmatmul.msk.f32.gmra.mxu0 %vm960_vm1, %v2034_v6 }
 0x759   : > { %v2011_v7 = vpop.f32.mrf.mxu3 }
 0x75a   : > { %v2012_v46 = vadd.f32 %v3288_v27, %v2011_v7 }
 0x75c   : > { %v2035_v45 = vmax.f32 %v2012_v46, 0.0 }
 0x75e   : > { %2498 = vmatmul.msk.f32.gmra.mxu0 %vm960_vm1, %v2035_v45 }
 0x761   : > { %v2014_v19 = vpop.f32.mrf.mxu3 }
 0x762   : > { %v2015_v48 = vadd.f32 %v3288_v27, %v2014_v19 }
 0x764   : > { %v2036_v53 = vmax.f32 %v2015_v48, 0.0 }
 0x766   : > { %2499 = vmatmul.msk.f32.gmra.mxu0 %vm960_vm1, %v2036_v53 }
 0x769   : > { %v2017_v54 = vpop.f32.mrf.mxu3 }
 0x76a   : > { %v2018_v22 = vadd.f32 %v2645_v28, %v2017_v54 }
 0x76c   : > { %v2037_v10 = vmax.f32 %v2018_v22, 0.0 }
 0x76e   : > { %2500 = vmatmul.msk.f32.gmra.mxu0 %vm960_vm1, %v2037_v10 }
 0x771   : > { %v2020_v0 = vpop.f32.mrf.mxu3 }
 0x772   : > { %v2021_v5 = vadd.f32 %v2645_v28, %v2020_v0 }
 0x774   : > { %v2038_v57 = vmax.f32 %v2021_v5, 0.0 }
 0x776   : > { %2501 = vmatmul.msk.f32.gmra.mxu0 %vm960_vm1, %v2038_v57 }
 0x77b   : > { %v2104_v50 = vpop.f32.mrf.mxu0 }
 0x77c   : > { %v2105_v14 = vadd.f32 %v3450_v32, %v2104_v50 }
 0x783   : > { %v2107_v39 = vpop.f32.mrf.mxu0 }
 0x784   : > { %v2108_v8 = vadd.f32 %v3450_v32, %v2107_v39 }
 0x78b   : > { %v2110_v27 = vpop.f32.mrf.mxu0 }
 0x78c   : > { %v2111_v42 = vadd.f32 %v3450_v32, %v2110_v27 }
 0x793   : > { %v2113_v18 = vpop.f32.mrf.mxu0 }
 0x794   : > { %v2114_v40 = vadd.f32 %v3450_v32, %v2113_v18 }
 0x79b   : > { %v2116_v15 = vpop.f32.mrf.mxu0 }
 0x79c   : > { %v2117_v55 = vadd.f32 %v3450_v32, %v2116_v15 }
 0x7a3   : > { %v2119_v38 = vpop.f32.mrf.mxu0 }
 0x7a4   : > { %v2120_v59 = vadd.f32 %v3450_v32, %v2119_v38 }
 0x7ab   : > { %v2122_v12 = vpop.f32.mrf.mxu0 }
 0x7ac   : > { %v2123_v37 = vadd.f32 %v3450_v32, %v2122_v12 }
 0x7b3   : > { %v2125_v44 = vpop.f32.mrf.mxu0 }
 0x7b4   : > { %v2126_v63 = vadd.f32 %v3450_v32, %v2125_v44 }
 0x7bb   : > { %v2128_v21 = vpop.f32.mrf.mxu0 }
 0x7bc   : > { %v2129_v35 = vadd.f32 %v3450_v32, %v2128_v21 }
 0x7c3   : > { %v2131_v23 = vpop.f32.mrf.mxu0 }
 0x7c4   : > { %v2132_v1 = vadd.f32 %v3450_v32, %v2131_v23 }
 0x7cb   : > { %v2134_v60 = vpop.f32.mrf.mxu0 }
 0x7cc   : > { %v2135_v49 = vadd.f32 %v3450_v32, %v2134_v60 }
 0x7d3   : > { %v2137_v25 = vpop.f32.mrf.mxu0 }
 0x7d4   : > { %v2138_v4 = vadd.f32 %v3450_v32, %v2137_v25 }
 0x7db   : > { %v2140_v31 = vpop.f32.mrf.mxu0 }
 0x7dc   : > { %v2141_v58 = vadd.f32 %v3450_v32, %v2140_v31 }
 0x7e3   : > { %v2143_v33 = vpop.f32.mrf.mxu0 }
 0x7e4   : > { %v2144_v3 = vadd.f32 %v3450_v32, %v2143_v33 }
 0x7eb   : > { %v2146_v41 = vpop.f32.mrf.mxu0 }
 0x7ec   : > { %v2147_v26 = vadd.f32 %v3450_v32, %v2146_v41 }
 0x7f3   : > { %v2149_v43 = vpop.f32.mrf.mxu0 }
 0x7f4   : > { %v2150_v9 = vadd.f32 %v3450_v32, %v2149_v43 }
 0x7f6   : > { %2154 = vmatpush.msra.mxu1 %v2150_v9 }
 0x7f8   : > { %2155 = vmatpush.msra.mxu1 %v2147_v26 }
 0x7fa   : > { %2156 = vmatpush.msra.mxu1 %v2144_v3 }
 0x7fc   : > { %2157 = vmatpush.msra.mxu1 %v2141_v58 }
 0x7fe   : > { %2158 = vmatpush.msra.mxu1 %v2138_v4 }
 0x800   : > { %2159 = vmatpush.msra.mxu1 %v2135_v49 }
 0x802   : > { %2160 = vmatpush.msra.mxu1 %v2132_v1 }
 0x804   : > { %2161 = vmatpush.msra.mxu1 %v2129_v35 }
 0x806   : > { %2162 = vmatpush.msra.mxu1 %v2126_v63 }
 0x808   : > { %2163 = vmatpush.msra.mxu1 %v2123_v37 }
 0x80a   : > { %2164 = vmatpush.msra.mxu1 %v2120_v59 }
 0x80c   : > { %2165 = vmatpush.msra.mxu1 %v2117_v55 }
 0x80e   : > { %2166 = vmatpush.msra.mxu1 %v2114_v40 }
 0x810   : > { %2167 = vmatpush.msra.mxu1 %v2111_v42 }
 0x812   : > { %2168 = vmatpush.msra.mxu1 %v2108_v8 }
 0x814   : > { %2169 = vmatpush.msra.mxu1 %v2105_v14 }
 0x815   : > { %2170 = vmatmul.f32.vlgmr.msra.gmra.mxu1 %v2502_v17 }
 0x892   : > { %v2171_v47 = vpop.f32.mrf.mxu1 }
 0x893   : > { %2175 = vst.msk [vmem:[%s3529_s22 + $0x8] sm:$0xff] %vm827_vm0, %v2171_v47 }
 0x894   : > { %2673 = shalt.err (!%p2670_p10)
}
 0x895   : > { %s2710_s18 = smov 128   ;;  %s2711_s22 = smov 8  }
 0x896   : > { %2590 = dma.vmem_to_hbm [thread:$0]  (%p2796_p6), %s2190_s17, 256, %s2192_s19, %s2177_s13, %s2710_s18, %s2710_s18, %s2711_s22  }
 0x897 PF: > { %s2206_s12 = sand.u32 1, %s2696_s27   ;;  %p2593_p11 = pnand %p2298_p9, %p2800_p8 }
 0x898   : > { %s2207_s20 = scalar_lea.sflag [#allocation4], %s2206_s12 }
 0x899   : > { %p2594_p12 = pneg %p2593_p11 }
 0x89b   : > { %2691 = dma.done.wait (%p2594_p12), %s2207_s20, 256  }
 0x89c   : > { %2693 = vsyncadd (%p2594_p12), %s2207_s20, 4294967040  ;;  %p18_p13 = scmp.ge.s32.totalorder %s2782_s11, 4   ;;  %s3698_s27 = smov %s2700_s28 }
 0x89d   : > { %s3699_s28 = smov %s2704_s29  ;;  %s3700_s29 = smov %s2794_s14 }
 0x89e   : > { %s3701_s30 = smov %s2782_s11  ;;  %20 = sbr.rel (!%p18_p13) target bundleno = 3 (0x3), region = 146 }
 0x8a3   :  { %2213 = vsyncpa [#allocation4], 1 }
 0x8a4   :  { %2215 = vsyncpa [#allocation4 + $0x1], 1 }

</bundles_post_ra>
